<compile_context>
chip_gen: v7x
topology: tpu7x:2x2x1
jax: 0.10.0
libtpu: 0.0.40
codegen_flags: <defaults>
</compile_context>

<pallas_src>
import functools

import jax
import jax.numpy as jnp
from jax import lax
from jax.experimental import pallas as pl
from jax.experimental.pallas import tpu as pltpu

EPS = 1e-8


def _embed_ln_kernel(tok_sref,            # (B*S,)     int32, SMEM (scalar prefetch)
                     words_hbm,           # (V, H)     f32, HBM (pl.ANY) — manual gather
                     pos_ref,             # (TS, H)    f32, VMEM (resident across batch axis)
                     gamma_ref,           # (1, H)     f32
                     beta_ref,            # (1, H)     f32
                     mask_ref,            # (1, TS, 1) f32 padding mask (precomputed)
                     out_ref,             # (1, TS, H) f32
                     wbuf,                # (2*TS, H)  f32 VMEM scratch, 2 gather slots
                     sem,                 # (2,)       DMA semaphores, one per slot
                     *, S, TS, V, padding_idx, unroll):
    sj = pl.program_id(0)                 # sequence-tile index (outer, "parallel")
    b = pl.program_id(1)                  # batch index         (inner, "arbitrary")
    nb = pl.num_programs(1)
    H = pos_ref.shape[-1]
    slot = b % 2                          # double-buffer slot holding tile (sj, b)

    def issue_tile(b_tile, slot_tile):
        """Issue the row-gather DMAs for tile (sj, b_tile) into slot `slot_tile`."""
        base = b_tile * S + sj * TS
        row0 = pl.multiple_of(slot_tile * TS, TS)

        def body(r, carry):
            tok = tok_sref[base + r]

            @pl.when(tok != padding_idx)
            def _():
                # clamp: TPU DMA has no runtime bounds check.
                tok_c = jnp.minimum(jnp.maximum(tok, 0), V - 1)
                pltpu.make_async_copy(words_hbm.at[pl.ds(tok_c, 1), :],
                                      wbuf.at[pl.ds(row0 + r, 1), :],
                                      sem.at[slot_tile]).start()

            @pl.when(tok == padding_idx)
            def _():
                # padding row: skip the HBM read, keep VMEM NaN-free.
                wbuf[pl.ds(row0 + r, 1), :] = jnp.zeros((1, H), jnp.float32)

            return carry

        lax.fori_loop(0, TS, body, 0, unroll=unroll)

    def wait_tile(b_tile, slot_tile):
        """Wait for the DMAs issued by issue_tile (same predicates, same shapes)."""
        base = b_tile * S + sj * TS
        row0 = pl.multiple_of(slot_tile * TS, TS)

        def body(r, carry):
            tok = tok_sref[base + r]

            @pl.when(tok != padding_idx)
            def _():
                tok_c = jnp.minimum(jnp.maximum(tok, 0), V - 1)
                pltpu.make_async_copy(words_hbm.at[pl.ds(tok_c, 1), :],
                                      wbuf.at[pl.ds(row0 + r, 1), :],
                                      sem.at[slot_tile]).wait()

            return carry

        lax.fori_loop(0, TS, body, 0, unroll=unroll)

    # Prime the pipeline at the start of every sj row (also covers each core's
    # first step under megacore sharding of the sj axis).
    @pl.when(b == 0)
    def _():
        issue_tile(b, slot)

    # Prefetch the next batch element's tile into the other slot; its DMAs run
    # while we compute the current tile below.
    @pl.when(b + 1 < nb)
    def _():
        issue_tile(b + 1, 1 - slot)

    # Current tile's rows were issued one step ago (or just primed) — wait.
    wait_tile(b, slot)

    # ---- word + positional embedding ----
    row0 = pl.multiple_of(slot * TS, TS)
    x = wbuf[pl.ds(row0, TS), :] + pos_ref[...]            # (TS, H)

    # ---- LayerNorm over H, fused single-pass statistics (clamped variance) ----
    s1 = jnp.sum(x, axis=-1, keepdims=True)                # (TS, 1)
    s2 = jnp.sum(x * x, axis=-1, keepdims=True)            # (TS, 1)
    mean = s1 * (1.0 / H)
    var = jnp.maximum(s2 * (1.0 / H) - mean * mean, 0.0)   # clamp: f32 cancellation
    y = (x - mean) * lax.rsqrt(var + EPS)
    y = y * gamma_ref[...] + beta_ref[...]                 # (1,H) broadcasts over (TS,H)

    # TODO(synk): dropout is a no-op here (eval semantics); training-mode dropout
    #             would use pltpu.prng_seed / pltpu.stateful_bernoulli.

    # ---- zero out padding tokens ----
    out_ref[...] = (y * mask_ref[0])[None]                 # (1, TS, H)


def word_and_positional_embedding(tokens, words, positions, gamma, beta,
                                  padding_idx, *, seq_tile=256):
    B, S = tokens.shape
    V, H = words.shape
    L = positions.shape[0]
    assert L >= S, "sequence longer than positional table"

    TS = min(S, seq_tile)
    # Prefer >= 2 sequence tiles so the "parallel" sj axis can be split across
    # the two TensorCores on v7x (megacore), keeping tiles sublane-aligned.
    if S // TS < 2 and S % 16 == 0:
        TS = S // 2
    assert S % TS == 0, "sequence length must be a multiple of the sequence tile"
    assert TS % 8 == 0 or TS == S, "sequence tile must be sublane-aligned"
    n_sj = S // TS

    tokens = tokens.astype(jnp.int32)
    tok_flat = tokens.reshape(B * S)                                   # SMEM gather addressing
    pad_mask = (tokens != padding_idx).astype(jnp.float32)[..., None]  # (B, S, 1)
    gamma2 = gamma.reshape(1, H).astype(jnp.float32)
    beta2 = beta.reshape(1, H).astype(jnp.float32)

    unroll = min(TS, 8)

    kernel = functools.partial(_embed_ln_kernel, S=S, TS=TS, V=V,
                               padding_idx=padding_idx, unroll=unroll)

    grid_spec = pltpu.PrefetchScalarGridSpec(
        num_scalar_prefetch=1,
        grid=(n_sj, B),                                 # batch innermost: positions stay resident
        in_specs=[
            pl.BlockSpec(memory_space=pl.ANY),                          # words stay in HBM
            pl.BlockSpec((TS, H), lambda sj, b, tok: (sj, 0)),          # positions slab
            pl.BlockSpec((1, H), lambda sj, b, tok: (0, 0)),            # gamma (resident)
            pl.BlockSpec((1, H), lambda sj, b, tok: (0, 0)),            # beta  (resident)
            pl.BlockSpec((1, TS, 1), lambda sj, b, tok: (b, sj, 0)),    # padding mask
        ],
        out_specs=pl.BlockSpec((1, TS, H), lambda sj, b, tok: (b, sj, 0)),
        scratch_shapes=[
            pltpu.VMEM((2 * TS, H), jnp.float32),       # 2-slot gathered word rows
            pltpu.SemaphoreType.DMA((2,)),              # one shared DMA sem per slot
        ],
    )

    return pl.pallas_call(
        kernel,
        out_shape=jax.ShapeDtypeStruct((B, S, H), jnp.float32),
        grid_spec=grid_spec,
        compiler_params=pltpu.CompilerParams(
            dimension_semantics=("parallel", "arbitrary"),  # sj sharded on v7x; b sequential
            vmem_limit_bytes=48 * 1024 * 1024,
        ),
    )(tok_flat, words, positions, gamma2, beta2, pad_mask)


def _reference(tokens, words, positions, gamma, beta, padding_idx):
    B, S = tokens.shape
    word_emb = words[tokens]                       # (B, S, H)
    pos_emb = positions[jnp.arange(S)][None]       # (1, S, H)
    x = word_emb + pos_emb
    mean = jnp.mean(x, axis=-1, keepdims=True)
    var = jnp.mean((x - mean) ** 2, axis=-1, keepdims=True)
    y = (x - mean) / jnp.sqrt(var + EPS) * gamma + beta
    mask = (tokens != padding_idx)[..., None].astype(y.dtype)
    return y * mask


if __name__ == "__main__":
    # Module config (small synthetic sizes)
    vocab_size = 64
    hidden_size = 32
    max_caption_length = 16
    padding_idx = 0
    batch, seq = 2, 8

    key = jax.random.PRNGKey(0)
    k_tok, k_w, k_p, k_g, k_b = jax.random.split(key, 5)

    # nn.Embedding default init: N(0, 1); padding row zeroed by padding_idx.
    words = jax.random.normal(k_w, (vocab_size, hidden_size), dtype=jnp.float32)
    words = words.at[padding_idx].set(0.0)
    positions = jax.random.normal(k_p, (max_caption_length, hidden_size),
                                  dtype=jnp.float32)
    # LayerNorm affine params (default init is ones/zeros; perturbed to exercise them).
    gamma = 1.0 + 0.1 * jax.random.normal(k_g, (hidden_size,), dtype=jnp.float32)
    beta = 0.05 * jax.random.normal(k_b, (hidden_size,), dtype=jnp.float32)

    tokens = jax.random.randint(k_tok, (batch, seq), 0, vocab_size,
                                dtype=jnp.int32)
    # ensure some padding tokens are present
    tokens = tokens.at[0, -2:].set(padding_idx)

    out = word_and_positional_embedding(tokens, words, positions, gamma, beta,
                                        padding_idx)
    out = jax.block_until_ready(out)

    ref = _reference(tokens, words, positions, gamma, beta, padding_idx)
    assert out.shape == (batch, seq, hidden_size)
    assert jnp.allclose(out, ref, atol=1e-4, rtol=1e-4), "mismatch vs reference"
    print("KERNEL_OK")
</pallas_src>

<mosaic_0001>
module attributes {stable_mosaic.version = 11 : i64} {
  func.func @_embed_ln_kernel(%arg0: i32, %arg1: i32, %arg2: memref<16xi32, #tpu.memory_space<smem>>, %arg3: memref<64x32xf32, #tpu.memory_space<any>>, %arg4: memref<8x32xf32, #tpu.memory_space<vmem>>, %arg5: memref<1x32xf32, #tpu.memory_space<vmem>>, %arg6: memref<1x32xf32, #tpu.memory_space<vmem>>, %arg7: memref<1x8x1xf32, #tpu.memory_space<vmem>>, %arg8: memref<1x8x32xf32, #tpu.memory_space<vmem>>, %arg9: memref<16x32xf32, #tpu.memory_space<vmem>>, %arg10: memref<2x!tpu.dma_semaphore, #tpu.memory_space<semaphore_mem>>) attributes {dimension_semantics = [#tpu.dimension_semantics<parallel>, #tpu.dimension_semantics<arbitrary>], iteration_bounds = array<i64: 1, 2>, scalar_prefetch = 1 : i64, scratch_operands = 2 : i64, tpu.core_type = #tpu.core_type<tc>, window_params = [{}, {transform_indices = @transform_1, window_bounds = array<i64: 8, 32>}, {pipeline_mode = #tpu.pipeline_mode<synchronous>, transform_indices = @transform_2, window_bounds = array<i64: 1, 32>}, {pipeline_mode = #tpu.pipeline_mode<synchronous>, transform_indices = @transform_3, window_bounds = array<i64: 1, 32>}, {transform_indices = @transform_4, window_bounds = array<i64: 1, 8, 1>}, {transform_indices = @transform_5, window_bounds = array<i64: 1, 8, 32>}]} {
    %c2_i32 = arith.constant 2 : i32
    %c0_i32 = arith.constant 0 : i32
    %0 = arith.cmpi eq, %c2_i32, %c0_i32 : i32
    %c1_i32 = arith.constant 1 : i32
    %1 = arith.select %0, %c1_i32, %c2_i32 : i32
    %2 = arith.remsi %arg1, %1 : i32
    %c0_i32_0 = arith.constant 0 : i32
    %3 = arith.cmpi ne, %2, %c0_i32_0 : i32
    %c0_i32_1 = arith.constant 0 : i32
    %4 = arith.cmpi slt, %2, %c0_i32_1 : i32
    %c0_i32_2 = arith.constant 0 : i32
    %5 = arith.cmpi slt, %1, %c0_i32_2 : i32
    %6 = arith.xori %4, %5 : i1
    %7 = arith.andi %6, %3 : i1
    %8 = arith.addi %2, %1 : i32
    %9 = arith.select %7, %8, %2 : i32
    %c0_i32_3 = arith.constant 0 : i32
    %10 = arith.cmpi eq, %arg1, %c0_i32_3 : i32
    %11 = arith.extui %10 : i1 to i32
    %c0_i32_4 = arith.constant 0 : i32
    %12 = arith.cmpi ne, %11, %c0_i32_4 : i32
    scf.if %12 {
      %c8_i32_48 = arith.constant 8 : i32
      %108 = arith.muli %arg1, %c8_i32_48 : i32
      %c8_i32_49 = arith.constant 8 : i32
      %109 = arith.muli %arg0, %c8_i32_49 : i32
      %110 = arith.addi %108, %109 : i32
      %c8_i32_50 = arith.constant 8 : i32
      %111 = arith.muli %9, %c8_i32_50 : i32
      %112 = tpu.assume_multiple %111, 8 : i32
      %c0_i32_51 = arith.constant 0 : i32
      %113 = arith.addi %110, %c0_i32_51 : i32
      %114 = arith.index_cast %113 : i32 to index
      %115 = memref.load %arg2[%114] : memref<16xi32, #tpu.memory_space<smem>>
      %c0_i32_52 = arith.constant 0 : i32
      %116 = arith.cmpi ne, %115, %c0_i32_52 : i32
      %117 = arith.extui %116 : i1 to i32
      %c0_i32_53 = arith.constant 0 : i32
      %118 = arith.cmpi ne, %117, %c0_i32_53 : i32
      scf.if %118 {
        %c0_i32_92 = arith.constant 0 : i32
        %185 = arith.maxsi %115, %c0_i32_92 : i32
        %c63_i32 = arith.constant 63 : i32
        %186 = arith.minsi %185, %c63_i32 : i32
        %187 = arith.addi %112, %c0_i32_51 : i32
        %c0_i32_93 = arith.constant 0 : i32
        %188 = tpu.memref_slice %arg3[%186, %c0_i32_93] : memref<64x32xf32, #tpu.memory_space<any>> -> memref<1x32xf32, #tpu.memory_space<any>>
        %c0_i32_94 = arith.constant 0 : i32
        %189 = tpu.memref_slice %arg9[%187, %c0_i32_94] : memref<16x32xf32, #tpu.memory_space<vmem>> -> memref<1x32xf32, #tpu.memory_space<vmem>>
        %190 = tpu.memref_slice %arg10[%9] : memref<2x!tpu.dma_semaphore, #tpu.memory_space<semaphore_mem>> -> memref<1x!tpu.dma_semaphore, #tpu.memory_space<semaphore_mem>>
        %191 = tpu.memref_squeeze %190 : memref<1x!tpu.dma_semaphore, #tpu.memory_space<semaphore_mem>> -> memref<!tpu.dma_semaphore, #tpu.memory_space<semaphore_mem>>
        tpu.enqueue_dma source(%188 : memref<1x32xf32, #tpu.memory_space<any>>) target(%189 : memref<1x32xf32, #tpu.memory_space<vmem>>) target_semaphore(%191 : memref<!tpu.dma_semaphore, #tpu.memory_space<semaphore_mem>>)
      } else {
      }
      %c0_i32_54 = arith.constant 0 : i32
      %119 = arith.cmpi eq, %115, %c0_i32_54 : i32
      %120 = arith.extui %119 : i1 to i32
      %c0_i32_55 = arith.constant 0 : i32
      %121 = arith.cmpi ne, %120, %c0_i32_55 : i32
      scf.if %121 {
        %cst_92 = arith.constant 0.000000e+00 : f32
        %185 = vector.broadcast %cst_92 : f32 to vector<1x32xf32>
        %186 = arith.addi %112, %c0_i32_51 : i32
        %187 = arith.index_cast %186 : i32 to index
        %c0_93 = arith.constant 0 : index
        %188 = vector.load %arg9[%187, %c0_93] : memref<16x32xf32, #tpu.memory_space<vmem>>, vector<1x32xf32>
        tpu.vector_store %arg9[%187, %c0_93], %185 {strides = array<i32>} : memref<16x32xf32, #tpu.memory_space<vmem>>, vector<1x32xf32>,
      } else {
      }
      %c1_i32_56 = arith.constant 1 : i32
      %122 = arith.addi %110, %c1_i32_56 : i32
      %123 = arith.index_cast %122 : i32 to index
      %124 = memref.load %arg2[%123] : memref<16xi32, #tpu.memory_space<smem>>
      %c0_i32_57 = arith.constant 0 : i32
      %125 = arith.cmpi ne, %124, %c0_i32_57 : i32
      %126 = arith.extui %125 : i1 to i32
      %c0_i32_58 = arith.constant 0 : i32
      %127 = arith.cmpi ne, %126, %c0_i32_58 : i32
      scf.if %127 {
        %c0_i32_92 = arith.constant 0 : i32
        %185 = arith.maxsi %124, %c0_i32_92 : i32
        %c63_i32 = arith.constant 63 : i32
        %186 = arith.minsi %185, %c63_i32 : i32
        %187 = arith.addi %112, %c1_i32_56 : i32
        %c0_i32_93 = arith.constant 0 : i32
        %188 = tpu.memref_slice %arg3[%186, %c0_i32_93] : memref<64x32xf32, #tpu.memory_space<any>> -> memref<1x32xf32, #tpu.memory_space<any>>
        %c0_i32_94 = arith.constant 0 : i32
        %189 = tpu.memref_slice %arg9[%187, %c0_i32_94] : memref<16x32xf32, #tpu.memory_space<vmem>> -> memref<1x32xf32, #tpu.memory_space<vmem>>
        %190 = tpu.memref_slice %arg10[%9] : memref<2x!tpu.dma_semaphore, #tpu.memory_space<semaphore_mem>> -> memref<1x!tpu.dma_semaphore, #tpu.memory_space<semaphore_mem>>
        %191 = tpu.memref_squeeze %190 : memref<1x!tpu.dma_semaphore, #tpu.memory_space<semaphore_mem>> -> memref<!tpu.dma_semaphore, #tpu.memory_space<semaphore_mem>>
        tpu.enqueue_dma source(%188 : memref<1x32xf32, #tpu.memory_space<any>>) target(%189 : memref<1x32xf32, #tpu.memory_space<vmem>>) target_semaphore(%191 : memref<!tpu.dma_semaphore, #tpu.memory_space<semaphore_mem>>)
      } else {
      }
      %c0_i32_59 = arith.constant 0 : i32
      %128 = arith.cmpi eq, %124, %c0_i32_59 : i32
      %129 = arith.extui %128 : i1 to i32
      %c0_i32_60 = arith.constant 0 : i32
      %130 = arith.cmpi ne, %129, %c0_i32_60 : i32
      scf.if %130 {
        %cst_92 = arith.constant 0.000000e+00 : f32
        %185 = vector.broadcast %cst_92 : f32 to vector<1x32xf32>
        %186 = arith.addi %112, %c1_i32_56 : i32
        %187 = arith.index_cast %186 : i32 to index
        %c0_93 = arith.constant 0 : index
        %188 = vector.load %arg9[%187, %c0_93] : memref<16x32xf32, #tpu.memory_space<vmem>>, vector<1x32xf32>
        tpu.vector_store %arg9[%187, %c0_93], %185 {strides = array<i32>} : memref<16x32xf32, #tpu.memory_space<vmem>>, vector<1x32xf32>,
      } else {
      }
      %c2_i32_61 = arith.constant 2 : i32
      %131 = arith.addi %110, %c2_i32_61 : i32
      %132 = arith.index_cast %131 : i32 to index
      %133 = memref.load %arg2[%132] : memref<16xi32, #tpu.memory_space<smem>>
      %c0_i32_62 = arith.constant 0 : i32
      %134 = arith.cmpi ne, %133, %c0_i32_62 : i32
      %135 = arith.extui %134 : i1 to i32
      %c0_i32_63 = arith.constant 0 : i32
      %136 = arith.cmpi ne, %135, %c0_i32_63 : i32
      scf.if %136 {
        %c0_i32_92 = arith.constant 0 : i32
        %185 = arith.maxsi %133, %c0_i32_92 : i32
        %c63_i32 = arith.constant 63 : i32
        %186 = arith.minsi %185, %c63_i32 : i32
        %187 = arith.addi %112, %c2_i32_61 : i32
        %c0_i32_93 = arith.constant 0 : i32
        %188 = tpu.memref_slice %arg3[%186, %c0_i32_93] : memref<64x32xf32, #tpu.memory_space<any>> -> memref<1x32xf32, #tpu.memory_space<any>>
        %c0_i32_94 = arith.constant 0 : i32
        %189 = tpu.memref_slice %arg9[%187, %c0_i32_94] : memref<16x32xf32, #tpu.memory_space<vmem>> -> memref<1x32xf32, #tpu.memory_space<vmem>>
        %190 = tpu.memref_slice %arg10[%9] : memref<2x!tpu.dma_semaphore, #tpu.memory_space<semaphore_mem>> -> memref<1x!tpu.dma_semaphore, #tpu.memory_space<semaphore_mem>>
        %191 = tpu.memref_squeeze %190 : memref<1x!tpu.dma_semaphore, #tpu.memory_space<semaphore_mem>> -> memref<!tpu.dma_semaphore, #tpu.memory_space<semaphore_mem>>
        tpu.enqueue_dma source(%188 : memref<1x32xf32, #tpu.memory_space<any>>) target(%189 : memref<1x32xf32, #tpu.memory_space<vmem>>) target_semaphore(%191 : memref<!tpu.dma_semaphore, #tpu.memory_space<semaphore_mem>>)
      } else {
      }
      %c0_i32_64 = arith.constant 0 : i32
      %137 = arith.cmpi eq, %133, %c0_i32_64 : i32
      %138 = arith.extui %137 : i1 to i32
      %c0_i32_65 = arith.constant 0 : i32
      %139 = arith.cmpi ne, %138, %c0_i32_65 : i32
      scf.if %139 {
        %cst_92 = arith.constant 0.000000e+00 : f32
        %185 = vector.broadcast %cst_92 : f32 to vector<1x32xf32>
        %186 = arith.addi %112, %c2_i32_61 : i32
        %187 = arith.index_cast %186 : i32 to index
        %c0_93 = arith.constant 0 : index
        %188 = vector.load %arg9[%187, %c0_93] : memref<16x32xf32, #tpu.memory_space<vmem>>, vector<1x32xf32>
        tpu.vector_store %arg9[%187, %c0_93], %185 {strides = array<i32>} : memref<16x32xf32, #tpu.memory_space<vmem>>, vector<1x32xf32>,
      } else {
      }
      %c3_i32_66 = arith.constant 3 : i32
      %140 = arith.addi %110, %c3_i32_66 : i32
      %141 = arith.index_cast %140 : i32 to index
      %142 = memref.load %arg2[%141] : memref<16xi32, #tpu.memory_space<smem>>
      %c0_i32_67 = arith.constant 0 : i32
      %143 = arith.cmpi ne, %142, %c0_i32_67 : i32
      %144 = arith.extui %143 : i1 to i32
      %c0_i32_68 = arith.constant 0 : i32
      %145 = arith.cmpi ne, %144, %c0_i32_68 : i32
      scf.if %145 {
        %c0_i32_92 = arith.constant 0 : i32
        %185 = arith.maxsi %142, %c0_i32_92 : i32
        %c63_i32 = arith.constant 63 : i32
        %186 = arith.minsi %185, %c63_i32 : i32
        %187 = arith.addi %112, %c3_i32_66 : i32
        %c0_i32_93 = arith.constant 0 : i32
        %188 = tpu.memref_slice %arg3[%186, %c0_i32_93] : memref<64x32xf32, #tpu.memory_space<any>> -> memref<1x32xf32, #tpu.memory_space<any>>
        %c0_i32_94 = arith.constant 0 : i32
        %189 = tpu.memref_slice %arg9[%187, %c0_i32_94] : memref<16x32xf32, #tpu.memory_space<vmem>> -> memref<1x32xf32, #tpu.memory_space<vmem>>
        %190 = tpu.memref_slice %arg10[%9] : memref<2x!tpu.dma_semaphore, #tpu.memory_space<semaphore_mem>> -> memref<1x!tpu.dma_semaphore, #tpu.memory_space<semaphore_mem>>
        %191 = tpu.memref_squeeze %190 : memref<1x!tpu.dma_semaphore, #tpu.memory_space<semaphore_mem>> -> memref<!tpu.dma_semaphore, #tpu.memory_space<semaphore_mem>>
        tpu.enqueue_dma source(%188 : memref<1x32xf32, #tpu.memory_space<any>>) target(%189 : memref<1x32xf32, #tpu.memory_space<vmem>>) target_semaphore(%191 : memref<!tpu.dma_semaphore, #tpu.memory_space<semaphore_mem>>)
      } else {
      }
      %c0_i32_69 = arith.constant 0 : i32
      %146 = arith.cmpi eq, %142, %c0_i32_69 : i32
      %147 = arith.extui %146 : i1 to i32
      %c0_i32_70 = arith.constant 0 : i32
      %148 = arith.cmpi ne, %147, %c0_i32_70 : i32
      scf.if %148 {
        %cst_92 = arith.constant 0.000000e+00 : f32
        %185 = vector.broadcast %cst_92 : f32 to vector<1x32xf32>
        %186 = arith.addi %112, %c3_i32_66 : i32
        %187 = arith.index_cast %186 : i32 to index
        %c0_93 = arith.constant 0 : index
        %188 = vector.load %arg9[%187, %c0_93] : memref<16x32xf32, #tpu.memory_space<vmem>>, vector<1x32xf32>
        tpu.vector_store %arg9[%187, %c0_93], %185 {strides = array<i32>} : memref<16x32xf32, #tpu.memory_space<vmem>>, vector<1x32xf32>,
      } else {
      }
      %c4_i32_71 = arith.constant 4 : i32
      %149 = arith.addi %110, %c4_i32_71 : i32
      %150 = arith.index_cast %149 : i32 to index
      %151 = memref.load %arg2[%150] : memref<16xi32, #tpu.memory_space<smem>>
      %c0_i32_72 = arith.constant 0 : i32
      %152 = arith.cmpi ne, %151, %c0_i32_72 : i32
      %153 = arith.extui %152 : i1 to i32
      %c0_i32_73 = arith.constant 0 : i32
      %154 = arith.cmpi ne, %153, %c0_i32_73 : i32
      scf.if %154 {
        %c0_i32_92 = arith.constant 0 : i32
        %185 = arith.maxsi %151, %c0_i32_92 : i32
        %c63_i32 = arith.constant 63 : i32
        %186 = arith.minsi %185, %c63_i32 : i32
        %187 = arith.addi %112, %c4_i32_71 : i32
        %c0_i32_93 = arith.constant 0 : i32
        %188 = tpu.memref_slice %arg3[%186, %c0_i32_93] : memref<64x32xf32, #tpu.memory_space<any>> -> memref<1x32xf32, #tpu.memory_space<any>>
        %c0_i32_94 = arith.constant 0 : i32
        %189 = tpu.memref_slice %arg9[%187, %c0_i32_94] : memref<16x32xf32, #tpu.memory_space<vmem>> -> memref<1x32xf32, #tpu.memory_space<vmem>>
        %190 = tpu.memref_slice %arg10[%9] : memref<2x!tpu.dma_semaphore, #tpu.memory_space<semaphore_mem>> -> memref<1x!tpu.dma_semaphore, #tpu.memory_space<semaphore_mem>>
        %191 = tpu.memref_squeeze %190 : memref<1x!tpu.dma_semaphore, #tpu.memory_space<semaphore_mem>> -> memref<!tpu.dma_semaphore, #tpu.memory_space<semaphore_mem>>
        tpu.enqueue_dma source(%188 : memref<1x32xf32, #tpu.memory_space<any>>) target(%189 : memref<1x32xf32, #tpu.memory_space<vmem>>) target_semaphore(%191 : memref<!tpu.dma_semaphore, #tpu.memory_space<semaphore_mem>>)
      } else {
      }
      %c0_i32_74 = arith.constant 0 : i32
      %155 = arith.cmpi eq, %151, %c0_i32_74 : i32
      %156 = arith.extui %155 : i1 to i32
      %c0_i32_75 = arith.constant 0 : i32
      %157 = arith.cmpi ne, %156, %c0_i32_75 : i32
      scf.if %157 {
        %cst_92 = arith.constant 0.000000e+00 : f32
        %185 = vector.broadcast %cst_92 : f32 to vector<1x32xf32>
        %186 = arith.addi %112, %c4_i32_71 : i32
        %187 = arith.index_cast %186 : i32 to index
        %c0_93 = arith.constant 0 : index
        %188 = vector.load %arg9[%187, %c0_93] : memref<16x32xf32, #tpu.memory_space<vmem>>, vector<1x32xf32>
        tpu.vector_store %arg9[%187, %c0_93], %185 {strides = array<i32>} : memref<16x32xf32, #tpu.memory_space<vmem>>, vector<1x32xf32>,
      } else {
      }
      %c5_i32_76 = arith.constant 5 : i32
      %158 = arith.addi %110, %c5_i32_76 : i32
      %159 = arith.index_cast %158 : i32 to index
      %160 = memref.load %arg2[%159] : memref<16xi32, #tpu.memory_space<smem>>
      %c0_i32_77 = arith.constant 0 : i32
      %161 = arith.cmpi ne, %160, %c0_i32_77 : i32
      %162 = arith.extui %161 : i1 to i32
      %c0_i32_78 = arith.constant 0 : i32
      %163 = arith.cmpi ne, %162, %c0_i32_78 : i32
      scf.if %163 {
        %c0_i32_92 = arith.constant 0 : i32
        %185 = arith.maxsi %160, %c0_i32_92 : i32
        %c63_i32 = arith.constant 63 : i32
        %186 = arith.minsi %185, %c63_i32 : i32
        %187 = arith.addi %112, %c5_i32_76 : i32
        %c0_i32_93 = arith.constant 0 : i32
        %188 = tpu.memref_slice %arg3[%186, %c0_i32_93] : memref<64x32xf32, #tpu.memory_space<any>> -> memref<1x32xf32, #tpu.memory_space<any>>
        %c0_i32_94 = arith.constant 0 : i32
        %189 = tpu.memref_slice %arg9[%187, %c0_i32_94] : memref<16x32xf32, #tpu.memory_space<vmem>> -> memref<1x32xf32, #tpu.memory_space<vmem>>
        %190 = tpu.memref_slice %arg10[%9] : memref<2x!tpu.dma_semaphore, #tpu.memory_space<semaphore_mem>> -> memref<1x!tpu.dma_semaphore, #tpu.memory_space<semaphore_mem>>
        %191 = tpu.memref_squeeze %190 : memref<1x!tpu.dma_semaphore, #tpu.memory_space<semaphore_mem>> -> memref<!tpu.dma_semaphore, #tpu.memory_space<semaphore_mem>>
        tpu.enqueue_dma source(%188 : memref<1x32xf32, #tpu.memory_space<any>>) target(%189 : memref<1x32xf32, #tpu.memory_space<vmem>>) target_semaphore(%191 : memref<!tpu.dma_semaphore, #tpu.memory_space<semaphore_mem>>)
      } else {
      }
      %c0_i32_79 = arith.constant 0 : i32
      %164 = arith.cmpi eq, %160, %c0_i32_79 : i32
      %165 = arith.extui %164 : i1 to i32
      %c0_i32_80 = arith.constant 0 : i32
      %166 = arith.cmpi ne, %165, %c0_i32_80 : i32
      scf.if %166 {
        %cst_92 = arith.constant 0.000000e+00 : f32
        %185 = vector.broadcast %cst_92 : f32 to vector<1x32xf32>
        %186 = arith.addi %112, %c5_i32_76 : i32
        %187 = arith.index_cast %186 : i32 to index
        %c0_93 = arith.constant 0 : index
        %188 = vector.load %arg9[%187, %c0_93] : memref<16x32xf32, #tpu.memory_space<vmem>>, vector<1x32xf32>
        tpu.vector_store %arg9[%187, %c0_93], %185 {strides = array<i32>} : memref<16x32xf32, #tpu.memory_space<vmem>>, vector<1x32xf32>,
      } else {
      }
      %c6_i32_81 = arith.constant 6 : i32
      %167 = arith.addi %110, %c6_i32_81 : i32
      %168 = arith.index_cast %167 : i32 to index
      %169 = memref.load %arg2[%168] : memref<16xi32, #tpu.memory_space<smem>>
      %c0_i32_82 = arith.constant 0 : i32
      %170 = arith.cmpi ne, %169, %c0_i32_82 : i32
      %171 = arith.extui %170 : i1 to i32
      %c0_i32_83 = arith.constant 0 : i32
      %172 = arith.cmpi ne, %171, %c0_i32_83 : i32
      scf.if %172 {
        %c0_i32_92 = arith.constant 0 : i32
        %185 = arith.maxsi %169, %c0_i32_92 : i32
        %c63_i32 = arith.constant 63 : i32
        %186 = arith.minsi %185, %c63_i32 : i32
        %187 = arith.addi %112, %c6_i32_81 : i32
        %c0_i32_93 = arith.constant 0 : i32
        %188 = tpu.memref_slice %arg3[%186, %c0_i32_93] : memref<64x32xf32, #tpu.memory_space<any>> -> memref<1x32xf32, #tpu.memory_space<any>>
        %c0_i32_94 = arith.constant 0 : i32
        %189 = tpu.memref_slice %arg9[%187, %c0_i32_94] : memref<16x32xf32, #tpu.memory_space<vmem>> -> memref<1x32xf32, #tpu.memory_space<vmem>>
        %190 = tpu.memref_slice %arg10[%9] : memref<2x!tpu.dma_semaphore, #tpu.memory_space<semaphore_mem>> -> memref<1x!tpu.dma_semaphore, #tpu.memory_space<semaphore_mem>>
        %191 = tpu.memref_squeeze %190 : memref<1x!tpu.dma_semaphore, #tpu.memory_space<semaphore_mem>> -> memref<!tpu.dma_semaphore, #tpu.memory_space<semaphore_mem>>
        tpu.enqueue_dma source(%188 : memref<1x32xf32, #tpu.memory_space<any>>) target(%189 : memref<1x32xf32, #tpu.memory_space<vmem>>) target_semaphore(%191 : memref<!tpu.dma_semaphore, #tpu.memory_space<semaphore_mem>>)
      } else {
      }
      %c0_i32_84 = arith.constant 0 : i32
      %173 = arith.cmpi eq, %169, %c0_i32_84 : i32
      %174 = arith.extui %173 : i1 to i32
      %c0_i32_85 = arith.constant 0 : i32
      %175 = arith.cmpi ne, %174, %c0_i32_85 : i32
      scf.if %175 {
        %cst_92 = arith.constant 0.000000e+00 : f32
        %185 = vector.broadcast %cst_92 : f32 to vector<1x32xf32>
        %186 = arith.addi %112, %c6_i32_81 : i32
        %187 = arith.index_cast %186 : i32 to index
        %c0_93 = arith.constant 0 : index
        %188 = vector.load %arg9[%187, %c0_93] : memref<16x32xf32, #tpu.memory_space<vmem>>, vector<1x32xf32>
        tpu.vector_store %arg9[%187, %c0_93], %185 {strides = array<i32>} : memref<16x32xf32, #tpu.memory_space<vmem>>, vector<1x32xf32>,
      } else {
      }
      %c7_i32_86 = arith.constant 7 : i32
      %176 = arith.addi %110, %c7_i32_86 : i32
      %177 = arith.index_cast %176 : i32 to index
      %178 = memref.load %arg2[%177] : memref<16xi32, #tpu.memory_space<smem>>
      %c0_i32_87 = arith.constant 0 : i32
      %179 = arith.cmpi ne, %178, %c0_i32_87 : i32
      %180 = arith.extui %179 : i1 to i32
      %c0_i32_88 = arith.constant 0 : i32
      %181 = arith.cmpi ne, %180, %c0_i32_88 : i32
      scf.if %181 {
        %c0_i32_92 = arith.constant 0 : i32
        %185 = arith.maxsi %178, %c0_i32_92 : i32
        %c63_i32 = arith.constant 63 : i32
        %186 = arith.minsi %185, %c63_i32 : i32
        %187 = arith.addi %112, %c7_i32_86 : i32
        %c0_i32_93 = arith.constant 0 : i32
        %188 = tpu.memref_slice %arg3[%186, %c0_i32_93] : memref<64x32xf32, #tpu.memory_space<any>> -> memref<1x32xf32, #tpu.memory_space<any>>
        %c0_i32_94 = arith.constant 0 : i32
        %189 = tpu.memref_slice %arg9[%187, %c0_i32_94] : memref<16x32xf32, #tpu.memory_space<vmem>> -> memref<1x32xf32, #tpu.memory_space<vmem>>
        %190 = tpu.memref_slice %arg10[%9] : memref<2x!tpu.dma_semaphore, #tpu.memory_space<semaphore_mem>> -> memref<1x!tpu.dma_semaphore, #tpu.memory_space<semaphore_mem>>
        %191 = tpu.memref_squeeze %190 : memref<1x!tpu.dma_semaphore, #tpu.memory_space<semaphore_mem>> -> memref<!tpu.dma_semaphore, #tpu.memory_space<semaphore_mem>>
        tpu.enqueue_dma source(%188 : memref<1x32xf32, #tpu.memory_space<any>>) target(%189 : memref<1x32xf32, #tpu.memory_space<vmem>>) target_semaphore(%191 : memref<!tpu.dma_semaphore, #tpu.memory_space<semaphore_mem>>)
      } else {
      }
      %c0_i32_89 = arith.constant 0 : i32
      %182 = arith.cmpi eq, %178, %c0_i32_89 : i32
      %183 = arith.extui %182 : i1 to i32
      %c0_i32_90 = arith.constant 0 : i32
      %184 = arith.cmpi ne, %183, %c0_i32_90 : i32
      scf.if %184 {
        %cst_92 = arith.constant 0.000000e+00 : f32
        %185 = vector.broadcast %cst_92 : f32 to vector<1x32xf32>
        %186 = arith.addi %112, %c7_i32_86 : i32
        %187 = arith.index_cast %186 : i32 to index
        %c0_93 = arith.constant 0 : index
        %188 = vector.load %arg9[%187, %c0_93] : memref<16x32xf32, #tpu.memory_space<vmem>>, vector<1x32xf32>
        tpu.vector_store %arg9[%187, %c0_93], %185 {strides = array<i32>} : memref<16x32xf32, #tpu.memory_space<vmem>>, vector<1x32xf32>,
      } else {
      }
      %c8_i32_91 = arith.constant 8 : i32
    } else {
    }
    %c1_i32_5 = arith.constant 1 : i32
    %13 = arith.addi %arg1, %c1_i32_5 : i32
    %c2_i32_6 = arith.constant 2 : i32
    %14 = arith.cmpi slt, %13, %c2_i32_6 : i32
    %15 = arith.extui %14 : i1 to i32
    %c0_i32_7 = arith.constant 0 : i32
    %16 = arith.cmpi ne, %15, %c0_i32_7 : i32
    scf.if %16 {
      %c1_i32_48 = arith.constant 1 : i32
      %108 = arith.addi %arg1, %c1_i32_48 : i32
      %c1_i32_49 = arith.constant 1 : i32
      %109 = arith.subi %c1_i32_49, %9 : i32
      %c8_i32_50 = arith.constant 8 : i32
      %110 = arith.muli %108, %c8_i32_50 : i32
      %c8_i32_51 = arith.constant 8 : i32
      %111 = arith.muli %arg0, %c8_i32_51 : i32
      %112 = arith.addi %110, %111 : i32
      %c8_i32_52 = arith.constant 8 : i32
      %113 = arith.muli %109, %c8_i32_52 : i32
      %114 = tpu.assume_multiple %113, 8 : i32
      %c0_i32_53 = arith.constant 0 : i32
      %115 = arith.addi %112, %c0_i32_53 : i32
      %116 = arith.index_cast %115 : i32 to index
      %117 = memref.load %arg2[%116] : memref<16xi32, #tpu.memory_space<smem>>
      %c0_i32_54 = arith.constant 0 : i32
      %118 = arith.cmpi ne, %117, %c0_i32_54 : i32
      %119 = arith.extui %118 : i1 to i32
      %c0_i32_55 = arith.constant 0 : i32
      %120 = arith.cmpi ne, %119, %c0_i32_55 : i32
      scf.if %120 {
        %c0_i32_94 = arith.constant 0 : i32
        %187 = arith.maxsi %117, %c0_i32_94 : i32
        %c63_i32 = arith.constant 63 : i32
        %188 = arith.minsi %187, %c63_i32 : i32
        %189 = arith.addi %114, %c0_i32_53 : i32
        %c0_i32_95 = arith.constant 0 : i32
        %190 = tpu.memref_slice %arg3[%188, %c0_i32_95] : memref<64x32xf32, #tpu.memory_space<any>> -> memref<1x32xf32, #tpu.memory_space<any>>
        %c0_i32_96 = arith.constant 0 : i32
        %191 = tpu.memref_slice %arg9[%189, %c0_i32_96] : memref<16x32xf32, #tpu.memory_space<vmem>> -> memref<1x32xf32, #tpu.memory_space<vmem>>
        %192 = tpu.memref_slice %arg10[%109] : memref<2x!tpu.dma_semaphore, #tpu.memory_space<semaphore_mem>> -> memref<1x!tpu.dma_semaphore, #tpu.memory_space<semaphore_mem>>
        %193 = tpu.memref_squeeze %192 : memref<1x!tpu.dma_semaphore, #tpu.memory_space<semaphore_mem>> -> memref<!tpu.dma_semaphore, #tpu.memory_space<semaphore_mem>>
        tpu.enqueue_dma source(%190 : memref<1x32xf32, #tpu.memory_space<any>>) target(%191 : memref<1x32xf32, #tpu.memory_space<vmem>>) target_semaphore(%193 : memref<!tpu.dma_semaphore, #tpu.memory_space<semaphore_mem>>)
      } else {
      }
      %c0_i32_56 = arith.constant 0 : i32
      %121 = arith.cmpi eq, %117, %c0_i32_56 : i32
      %122 = arith.extui %121 : i1 to i32
      %c0_i32_57 = arith.constant 0 : i32
      %123 = arith.cmpi ne, %122, %c0_i32_57 : i32
      scf.if %123 {
        %cst_94 = arith.constant 0.000000e+00 : f32
        %187 = vector.broadcast %cst_94 : f32 to vector<1x32xf32>
        %188 = arith.addi %114, %c0_i32_53 : i32
        %189 = arith.index_cast %188 : i32 to index
        %c0_95 = arith.constant 0 : index
        %190 = vector.load %arg9[%189, %c0_95] : memref<16x32xf32, #tpu.memory_space<vmem>>, vector<1x32xf32>
        tpu.vector_store %arg9[%189, %c0_95], %187 {strides = array<i32>} : memref<16x32xf32, #tpu.memory_space<vmem>>, vector<1x32xf32>,
      } else {
      }
      %c1_i32_58 = arith.constant 1 : i32
      %124 = arith.addi %112, %c1_i32_58 : i32
      %125 = arith.index_cast %124 : i32 to index
      %126 = memref.load %arg2[%125] : memref<16xi32, #tpu.memory_space<smem>>
      %c0_i32_59 = arith.constant 0 : i32
      %127 = arith.cmpi ne, %126, %c0_i32_59 : i32
      %128 = arith.extui %127 : i1 to i32
      %c0_i32_60 = arith.constant 0 : i32
      %129 = arith.cmpi ne, %128, %c0_i32_60 : i32
      scf.if %129 {
        %c0_i32_94 = arith.constant 0 : i32
        %187 = arith.maxsi %126, %c0_i32_94 : i32
        %c63_i32 = arith.constant 63 : i32
        %188 = arith.minsi %187, %c63_i32 : i32
        %189 = arith.addi %114, %c1_i32_58 : i32
        %c0_i32_95 = arith.constant 0 : i32
        %190 = tpu.memref_slice %arg3[%188, %c0_i32_95] : memref<64x32xf32, #tpu.memory_space<any>> -> memref<1x32xf32, #tpu.memory_space<any>>
        %c0_i32_96 = arith.constant 0 : i32
        %191 = tpu.memref_slice %arg9[%189, %c0_i32_96] : memref<16x32xf32, #tpu.memory_space<vmem>> -> memref<1x32xf32, #tpu.memory_space<vmem>>
        %192 = tpu.memref_slice %arg10[%109] : memref<2x!tpu.dma_semaphore, #tpu.memory_space<semaphore_mem>> -> memref<1x!tpu.dma_semaphore, #tpu.memory_space<semaphore_mem>>
        %193 = tpu.memref_squeeze %192 : memref<1x!tpu.dma_semaphore, #tpu.memory_space<semaphore_mem>> -> memref<!tpu.dma_semaphore, #tpu.memory_space<semaphore_mem>>
        tpu.enqueue_dma source(%190 : memref<1x32xf32, #tpu.memory_space<any>>) target(%191 : memref<1x32xf32, #tpu.memory_space<vmem>>) target_semaphore(%193 : memref<!tpu.dma_semaphore, #tpu.memory_space<semaphore_mem>>)
      } else {
      }
      %c0_i32_61 = arith.constant 0 : i32
      %130 = arith.cmpi eq, %126, %c0_i32_61 : i32
      %131 = arith.extui %130 : i1 to i32
      %c0_i32_62 = arith.constant 0 : i32
      %132 = arith.cmpi ne, %131, %c0_i32_62 : i32
      scf.if %132 {
        %cst_94 = arith.constant 0.000000e+00 : f32
        %187 = vector.broadcast %cst_94 : f32 to vector<1x32xf32>
        %188 = arith.addi %114, %c1_i32_58 : i32
        %189 = arith.index_cast %188 : i32 to index
        %c0_95 = arith.constant 0 : index
        %190 = vector.load %arg9[%189, %c0_95] : memref<16x32xf32, #tpu.memory_space<vmem>>, vector<1x32xf32>
        tpu.vector_store %arg9[%189, %c0_95], %187 {strides = array<i32>} : memref<16x32xf32, #tpu.memory_space<vmem>>, vector<1x32xf32>,
      } else {
      }
      %c2_i32_63 = arith.constant 2 : i32
      %133 = arith.addi %112, %c2_i32_63 : i32
      %134 = arith.index_cast %133 : i32 to index
      %135 = memref.load %arg2[%134] : memref<16xi32, #tpu.memory_space<smem>>
      %c0_i32_64 = arith.constant 0 : i32
      %136 = arith.cmpi ne, %135, %c0_i32_64 : i32
      %137 = arith.extui %136 : i1 to i32
      %c0_i32_65 = arith.constant 0 : i32
      %138 = arith.cmpi ne, %137, %c0_i32_65 : i32
      scf.if %138 {
        %c0_i32_94 = arith.constant 0 : i32
        %187 = arith.maxsi %135, %c0_i32_94 : i32
        %c63_i32 = arith.constant 63 : i32
        %188 = arith.minsi %187, %c63_i32 : i32
        %189 = arith.addi %114, %c2_i32_63 : i32
        %c0_i32_95 = arith.constant 0 : i32
        %190 = tpu.memref_slice %arg3[%188, %c0_i32_95] : memref<64x32xf32, #tpu.memory_space<any>> -> memref<1x32xf32, #tpu.memory_space<any>>
        %c0_i32_96 = arith.constant 0 : i32
        %191 = tpu.memref_slice %arg9[%189, %c0_i32_96] : memref<16x32xf32, #tpu.memory_space<vmem>> -> memref<1x32xf32, #tpu.memory_space<vmem>>
        %192 = tpu.memref_slice %arg10[%109] : memref<2x!tpu.dma_semaphore, #tpu.memory_space<semaphore_mem>> -> memref<1x!tpu.dma_semaphore, #tpu.memory_space<semaphore_mem>>
        %193 = tpu.memref_squeeze %192 : memref<1x!tpu.dma_semaphore, #tpu.memory_space<semaphore_mem>> -> memref<!tpu.dma_semaphore, #tpu.memory_space<semaphore_mem>>
        tpu.enqueue_dma source(%190 : memref<1x32xf32, #tpu.memory_space<any>>) target(%191 : memref<1x32xf32, #tpu.memory_space<vmem>>) target_semaphore(%193 : memref<!tpu.dma_semaphore, #tpu.memory_space<semaphore_mem>>)
      } else {
      }
      %c0_i32_66 = arith.constant 0 : i32
      %139 = arith.cmpi eq, %135, %c0_i32_66 : i32
      %140 = arith.extui %139 : i1 to i32
      %c0_i32_67 = arith.constant 0 : i32
      %141 = arith.cmpi ne, %140, %c0_i32_67 : i32
      scf.if %141 {
        %cst_94 = arith.constant 0.000000e+00 : f32
        %187 = vector.broadcast %cst_94 : f32 to vector<1x32xf32>
        %188 = arith.addi %114, %c2_i32_63 : i32
        %189 = arith.index_cast %188 : i32 to index
        %c0_95 = arith.constant 0 : index
        %190 = vector.load %arg9[%189, %c0_95] : memref<16x32xf32, #tpu.memory_space<vmem>>, vector<1x32xf32>
        tpu.vector_store %arg9[%189, %c0_95], %187 {strides = array<i32>} : memref<16x32xf32, #tpu.memory_space<vmem>>, vector<1x32xf32>,
      } else {
      }
      %c3_i32_68 = arith.constant 3 : i32
      %142 = arith.addi %112, %c3_i32_68 : i32
      %143 = arith.index_cast %142 : i32 to index
      %144 = memref.load %arg2[%143] : memref<16xi32, #tpu.memory_space<smem>>
      %c0_i32_69 = arith.constant 0 : i32
      %145 = arith.cmpi ne, %144, %c0_i32_69 : i32
      %146 = arith.extui %145 : i1 to i32
      %c0_i32_70 = arith.constant 0 : i32
      %147 = arith.cmpi ne, %146, %c0_i32_70 : i32
      scf.if %147 {
        %c0_i32_94 = arith.constant 0 : i32
        %187 = arith.maxsi %144, %c0_i32_94 : i32
        %c63_i32 = arith.constant 63 : i32
        %188 = arith.minsi %187, %c63_i32 : i32
        %189 = arith.addi %114, %c3_i32_68 : i32
        %c0_i32_95 = arith.constant 0 : i32
        %190 = tpu.memref_slice %arg3[%188, %c0_i32_95] : memref<64x32xf32, #tpu.memory_space<any>> -> memref<1x32xf32, #tpu.memory_space<any>>
        %c0_i32_96 = arith.constant 0 : i32
        %191 = tpu.memref_slice %arg9[%189, %c0_i32_96] : memref<16x32xf32, #tpu.memory_space<vmem>> -> memref<1x32xf32, #tpu.memory_space<vmem>>
        %192 = tpu.memref_slice %arg10[%109] : memref<2x!tpu.dma_semaphore, #tpu.memory_space<semaphore_mem>> -> memref<1x!tpu.dma_semaphore, #tpu.memory_space<semaphore_mem>>
        %193 = tpu.memref_squeeze %192 : memref<1x!tpu.dma_semaphore, #tpu.memory_space<semaphore_mem>> -> memref<!tpu.dma_semaphore, #tpu.memory_space<semaphore_mem>>
        tpu.enqueue_dma source(%190 : memref<1x32xf32, #tpu.memory_space<any>>) target(%191 : memref<1x32xf32, #tpu.memory_space<vmem>>) target_semaphore(%193 : memref<!tpu.dma_semaphore, #tpu.memory_space<semaphore_mem>>)
      } else {
      }
      %c0_i32_71 = arith.constant 0 : i32
      %148 = arith.cmpi eq, %144, %c0_i32_71 : i32
      %149 = arith.extui %148 : i1 to i32
      %c0_i32_72 = arith.constant 0 : i32
      %150 = arith.cmpi ne, %149, %c0_i32_72 : i32
      scf.if %150 {
        %cst_94 = arith.constant 0.000000e+00 : f32
        %187 = vector.broadcast %cst_94 : f32 to vector<1x32xf32>
        %188 = arith.addi %114, %c3_i32_68 : i32
        %189 = arith.index_cast %188 : i32 to index
        %c0_95 = arith.constant 0 : index
        %190 = vector.load %arg9[%189, %c0_95] : memref<16x32xf32, #tpu.memory_space<vmem>>, vector<1x32xf32>
        tpu.vector_store %arg9[%189, %c0_95], %187 {strides = array<i32>} : memref<16x32xf32, #tpu.memory_space<vmem>>, vector<1x32xf32>,
      } else {
      }
      %c4_i32_73 = arith.constant 4 : i32
      %151 = arith.addi %112, %c4_i32_73 : i32
      %152 = arith.index_cast %151 : i32 to index
      %153 = memref.load %arg2[%152] : memref<16xi32, #tpu.memory_space<smem>>
      %c0_i32_74 = arith.constant 0 : i32
      %154 = arith.cmpi ne, %153, %c0_i32_74 : i32
      %155 = arith.extui %154 : i1 to i32
      %c0_i32_75 = arith.constant 0 : i32
      %156 = arith.cmpi ne, %155, %c0_i32_75 : i32
      scf.if %156 {
        %c0_i32_94 = arith.constant 0 : i32
        %187 = arith.maxsi %153, %c0_i32_94 : i32
        %c63_i32 = arith.constant 63 : i32
        %188 = arith.minsi %187, %c63_i32 : i32
        %189 = arith.addi %114, %c4_i32_73 : i32
        %c0_i32_95 = arith.constant 0 : i32
        %190 = tpu.memref_slice %arg3[%188, %c0_i32_95] : memref<64x32xf32, #tpu.memory_space<any>> -> memref<1x32xf32, #tpu.memory_space<any>>
        %c0_i32_96 = arith.constant 0 : i32
        %191 = tpu.memref_slice %arg9[%189, %c0_i32_96] : memref<16x32xf32, #tpu.memory_space<vmem>> -> memref<1x32xf32, #tpu.memory_space<vmem>>
        %192 = tpu.memref_slice %arg10[%109] : memref<2x!tpu.dma_semaphore, #tpu.memory_space<semaphore_mem>> -> memref<1x!tpu.dma_semaphore, #tpu.memory_space<semaphore_mem>>
        %193 = tpu.memref_squeeze %192 : memref<1x!tpu.dma_semaphore, #tpu.memory_space<semaphore_mem>> -> memref<!tpu.dma_semaphore, #tpu.memory_space<semaphore_mem>>
        tpu.enqueue_dma source(%190 : memref<1x32xf32, #tpu.memory_space<any>>) target(%191 : memref<1x32xf32, #tpu.memory_space<vmem>>) target_semaphore(%193 : memref<!tpu.dma_semaphore, #tpu.memory_space<semaphore_mem>>)
      } else {
      }
      %c0_i32_76 = arith.constant 0 : i32
      %157 = arith.cmpi eq, %153, %c0_i32_76 : i32
      %158 = arith.extui %157 : i1 to i32
      %c0_i32_77 = arith.constant 0 : i32
      %159 = arith.cmpi ne, %158, %c0_i32_77 : i32
      scf.if %159 {
        %cst_94 = arith.constant 0.000000e+00 : f32
        %187 = vector.broadcast %cst_94 : f32 to vector<1x32xf32>
        %188 = arith.addi %114, %c4_i32_73 : i32
        %189 = arith.index_cast %188 : i32 to index
        %c0_95 = arith.constant 0 : index
        %190 = vector.load %arg9[%189, %c0_95] : memref<16x32xf32, #tpu.memory_space<vmem>>, vector<1x32xf32>
        tpu.vector_store %arg9[%189, %c0_95], %187 {strides = array<i32>} : memref<16x32xf32, #tpu.memory_space<vmem>>, vector<1x32xf32>,
      } else {
      }
      %c5_i32_78 = arith.constant 5 : i32
      %160 = arith.addi %112, %c5_i32_78 : i32
      %161 = arith.index_cast %160 : i32 to index
      %162 = memref.load %arg2[%161] : memref<16xi32, #tpu.memory_space<smem>>
      %c0_i32_79 = arith.constant 0 : i32
      %163 = arith.cmpi ne, %162, %c0_i32_79 : i32
      %164 = arith.extui %163 : i1 to i32
      %c0_i32_80 = arith.constant 0 : i32
      %165 = arith.cmpi ne, %164, %c0_i32_80 : i32
      scf.if %165 {
        %c0_i32_94 = arith.constant 0 : i32
        %187 = arith.maxsi %162, %c0_i32_94 : i32
        %c63_i32 = arith.constant 63 : i32
        %188 = arith.minsi %187, %c63_i32 : i32
        %189 = arith.addi %114, %c5_i32_78 : i32
        %c0_i32_95 = arith.constant 0 : i32
        %190 = tpu.memref_slice %arg3[%188, %c0_i32_95] : memref<64x32xf32, #tpu.memory_space<any>> -> memref<1x32xf32, #tpu.memory_space<any>>
        %c0_i32_96 = arith.constant 0 : i32
        %191 = tpu.memref_slice %arg9[%189, %c0_i32_96] : memref<16x32xf32, #tpu.memory_space<vmem>> -> memref<1x32xf32, #tpu.memory_space<vmem>>
        %192 = tpu.memref_slice %arg10[%109] : memref<2x!tpu.dma_semaphore, #tpu.memory_space<semaphore_mem>> -> memref<1x!tpu.dma_semaphore, #tpu.memory_space<semaphore_mem>>
        %193 = tpu.memref_squeeze %192 : memref<1x!tpu.dma_semaphore, #tpu.memory_space<semaphore_mem>> -> memref<!tpu.dma_semaphore, #tpu.memory_space<semaphore_mem>>
        tpu.enqueue_dma source(%190 : memref<1x32xf32, #tpu.memory_space<any>>) target(%191 : memref<1x32xf32, #tpu.memory_space<vmem>>) target_semaphore(%193 : memref<!tpu.dma_semaphore, #tpu.memory_space<semaphore_mem>>)
      } else {
      }
      %c0_i32_81 = arith.constant 0 : i32
      %166 = arith.cmpi eq, %162, %c0_i32_81 : i32
      %167 = arith.extui %166 : i1 to i32
      %c0_i32_82 = arith.constant 0 : i32
      %168 = arith.cmpi ne, %167, %c0_i32_82 : i32
      scf.if %168 {
        %cst_94 = arith.constant 0.000000e+00 : f32
        %187 = vector.broadcast %cst_94 : f32 to vector<1x32xf32>
        %188 = arith.addi %114, %c5_i32_78 : i32
        %189 = arith.index_cast %188 : i32 to index
        %c0_95 = arith.constant 0 : index
        %190 = vector.load %arg9[%189, %c0_95] : memref<16x32xf32, #tpu.memory_space<vmem>>, vector<1x32xf32>
        tpu.vector_store %arg9[%189, %c0_95], %187 {strides = array<i32>} : memref<16x32xf32, #tpu.memory_space<vmem>>, vector<1x32xf32>,
      } else {
      }
      %c6_i32_83 = arith.constant 6 : i32
      %169 = arith.addi %112, %c6_i32_83 : i32
      %170 = arith.index_cast %169 : i32 to index
      %171 = memref.load %arg2[%170] : memref<16xi32, #tpu.memory_space<smem>>
      %c0_i32_84 = arith.constant 0 : i32
      %172 = arith.cmpi ne, %171, %c0_i32_84 : i32
      %173 = arith.extui %172 : i1 to i32
      %c0_i32_85 = arith.constant 0 : i32
      %174 = arith.cmpi ne, %173, %c0_i32_85 : i32
      scf.if %174 {
        %c0_i32_94 = arith.constant 0 : i32
        %187 = arith.maxsi %171, %c0_i32_94 : i32
        %c63_i32 = arith.constant 63 : i32
        %188 = arith.minsi %187, %c63_i32 : i32
        %189 = arith.addi %114, %c6_i32_83 : i32
        %c0_i32_95 = arith.constant 0 : i32
        %190 = tpu.memref_slice %arg3[%188, %c0_i32_95] : memref<64x32xf32, #tpu.memory_space<any>> -> memref<1x32xf32, #tpu.memory_space<any>>
        %c0_i32_96 = arith.constant 0 : i32
        %191 = tpu.memref_slice %arg9[%189, %c0_i32_96] : memref<16x32xf32, #tpu.memory_space<vmem>> -> memref<1x32xf32, #tpu.memory_space<vmem>>
        %192 = tpu.memref_slice %arg10[%109] : memref<2x!tpu.dma_semaphore, #tpu.memory_space<semaphore_mem>> -> memref<1x!tpu.dma_semaphore, #tpu.memory_space<semaphore_mem>>
        %193 = tpu.memref_squeeze %192 : memref<1x!tpu.dma_semaphore, #tpu.memory_space<semaphore_mem>> -> memref<!tpu.dma_semaphore, #tpu.memory_space<semaphore_mem>>
        tpu.enqueue_dma source(%190 : memref<1x32xf32, #tpu.memory_space<any>>) target(%191 : memref<1x32xf32, #tpu.memory_space<vmem>>) target_semaphore(%193 : memref<!tpu.dma_semaphore, #tpu.memory_space<semaphore_mem>>)
      } else {
      }
      %c0_i32_86 = arith.constant 0 : i32
      %175 = arith.cmpi eq, %171, %c0_i32_86 : i32
      %176 = arith.extui %175 : i1 to i32
      %c0_i32_87 = arith.constant 0 : i32
      %177 = arith.cmpi ne, %176, %c0_i32_87 : i32
      scf.if %177 {
        %cst_94 = arith.constant 0.000000e+00 : f32
        %187 = vector.broadcast %cst_94 : f32 to vector<1x32xf32>
        %188 = arith.addi %114, %c6_i32_83 : i32
        %189 = arith.index_cast %188 : i32 to index
        %c0_95 = arith.constant 0 : index
        %190 = vector.load %arg9[%189, %c0_95] : memref<16x32xf32, #tpu.memory_space<vmem>>, vector<1x32xf32>
        tpu.vector_store %arg9[%189, %c0_95], %187 {strides = array<i32>} : memref<16x32xf32, #tpu.memory_space<vmem>>, vector<1x32xf32>,
      } else {
      }
      %c7_i32_88 = arith.constant 7 : i32
      %178 = arith.addi %112, %c7_i32_88 : i32
      %179 = arith.index_cast %178 : i32 to index
      %180 = memref.load %arg2[%179] : memref<16xi32, #tpu.memory_space<smem>>
      %c0_i32_89 = arith.constant 0 : i32
      %181 = arith.cmpi ne, %180, %c0_i32_89 : i32
      %182 = arith.extui %181 : i1 to i32
      %c0_i32_90 = arith.constant 0 : i32
      %183 = arith.cmpi ne, %182, %c0_i32_90 : i32
      scf.if %183 {
        %c0_i32_94 = arith.constant 0 : i32
        %187 = arith.maxsi %180, %c0_i32_94 : i32
        %c63_i32 = arith.constant 63 : i32
        %188 = arith.minsi %187, %c63_i32 : i32
        %189 = arith.addi %114, %c7_i32_88 : i32
        %c0_i32_95 = arith.constant 0 : i32
        %190 = tpu.memref_slice %arg3[%188, %c0_i32_95] : memref<64x32xf32, #tpu.memory_space<any>> -> memref<1x32xf32, #tpu.memory_space<any>>
        %c0_i32_96 = arith.constant 0 : i32
        %191 = tpu.memref_slice %arg9[%189, %c0_i32_96] : memref<16x32xf32, #tpu.memory_space<vmem>> -> memref<1x32xf32, #tpu.memory_space<vmem>>
        %192 = tpu.memref_slice %arg10[%109] : memref<2x!tpu.dma_semaphore, #tpu.memory_space<semaphore_mem>> -> memref<1x!tpu.dma_semaphore, #tpu.memory_space<semaphore_mem>>
        %193 = tpu.memref_squeeze %192 : memref<1x!tpu.dma_semaphore, #tpu.memory_space<semaphore_mem>> -> memref<!tpu.dma_semaphore, #tpu.memory_space<semaphore_mem>>
        tpu.enqueue_dma source(%190 : memref<1x32xf32, #tpu.memory_space<any>>) target(%191 : memref<1x32xf32, #tpu.memory_space<vmem>>) target_semaphore(%193 : memref<!tpu.dma_semaphore, #tpu.memory_space<semaphore_mem>>)
      } else {
      }
      %c0_i32_91 = arith.constant 0 : i32
      %184 = arith.cmpi eq, %180, %c0_i32_91 : i32
      %185 = arith.extui %184 : i1 to i32
      %c0_i32_92 = arith.constant 0 : i32
      %186 = arith.cmpi ne, %185, %c0_i32_92 : i32
      scf.if %186 {
        %cst_94 = arith.constant 0.000000e+00 : f32
        %187 = vector.broadcast %cst_94 : f32 to vector<1x32xf32>
        %188 = arith.addi %114, %c7_i32_88 : i32
        %189 = arith.index_cast %188 : i32 to index
        %c0_95 = arith.constant 0 : index
        %190 = vector.load %arg9[%189, %c0_95] : memref<16x32xf32, #tpu.memory_space<vmem>>, vector<1x32xf32>
        tpu.vector_store %arg9[%189, %c0_95], %187 {strides = array<i32>} : memref<16x32xf32, #tpu.memory_space<vmem>>, vector<1x32xf32>,
      } else {
      }
      %c8_i32_93 = arith.constant 8 : i32
    } else {
    }
    %c8_i32 = arith.constant 8 : i32
    %17 = arith.muli %arg1, %c8_i32 : i32
    %c8_i32_8 = arith.constant 8 : i32
    %18 = arith.muli %arg0, %c8_i32_8 : i32
    %19 = arith.addi %17, %18 : i32
    %c8_i32_9 = arith.constant 8 : i32
    %20 = arith.muli %9, %c8_i32_9 : i32
    %21 = tpu.assume_multiple %20, 8 : i32
    %c0_i32_10 = arith.constant 0 : i32
    %22 = arith.addi %19, %c0_i32_10 : i32
    %23 = arith.index_cast %22 : i32 to index
    %24 = memref.load %arg2[%23] : memref<16xi32, #tpu.memory_space<smem>>
    %c0_i32_11 = arith.constant 0 : i32
    %25 = arith.cmpi ne, %24, %c0_i32_11 : i32
    %26 = arith.extui %25 : i1 to i32
    %c0_i32_12 = arith.constant 0 : i32
    %27 = arith.cmpi ne, %26, %c0_i32_12 : i32
    scf.if %27 {
      %c0_i32_48 = arith.constant 0 : i32
      %108 = arith.maxsi %24, %c0_i32_48 : i32
      %c63_i32 = arith.constant 63 : i32
      %109 = arith.minsi %108, %c63_i32 : i32
      %110 = arith.addi %21, %c0_i32_10 : i32
      %c0_i32_49 = arith.constant 0 : i32
      %111 = tpu.memref_slice %arg3[%109, %c0_i32_49] : memref<64x32xf32, #tpu.memory_space<any>> -> memref<1x32xf32, #tpu.memory_space<any>>
      %c0_i32_50 = arith.constant 0 : i32
      %112 = tpu.memref_slice %arg9[%110, %c0_i32_50] : memref<16x32xf32, #tpu.memory_space<vmem>> -> memref<1x32xf32, #tpu.memory_space<vmem>>
      %113 = tpu.memref_slice %arg10[%9] : memref<2x!tpu.dma_semaphore, #tpu.memory_space<semaphore_mem>> -> memref<1x!tpu.dma_semaphore, #tpu.memory_space<semaphore_mem>>
      %114 = tpu.memref_squeeze %113 : memref<1x!tpu.dma_semaphore, #tpu.memory_space<semaphore_mem>> -> memref<!tpu.dma_semaphore, #tpu.memory_space<semaphore_mem>>
      tpu.wait_dma2 semaphore(%114 : memref<!tpu.dma_semaphore, #tpu.memory_space<semaphore_mem>>) src(%111 : memref<1x32xf32, #tpu.memory_space<any>>) dst(%112 : memref<1x32xf32, #tpu.memory_space<vmem>>)
    } else {
    }
    %c1_i32_13 = arith.constant 1 : i32
    %28 = arith.addi %19, %c1_i32_13 : i32
    %29 = arith.index_cast %28 : i32 to index
    %30 = memref.load %arg2[%29] : memref<16xi32, #tpu.memory_space<smem>>
    %c0_i32_14 = arith.constant 0 : i32
    %31 = arith.cmpi ne, %30, %c0_i32_14 : i32
    %32 = arith.extui %31 : i1 to i32
    %c0_i32_15 = arith.constant 0 : i32
    %33 = arith.cmpi ne, %32, %c0_i32_15 : i32
    scf.if %33 {
      %c0_i32_48 = arith.constant 0 : i32
      %108 = arith.maxsi %30, %c0_i32_48 : i32
      %c63_i32 = arith.constant 63 : i32
      %109 = arith.minsi %108, %c63_i32 : i32
      %110 = arith.addi %21, %c1_i32_13 : i32
      %c0_i32_49 = arith.constant 0 : i32
      %111 = tpu.memref_slice %arg3[%109, %c0_i32_49] : memref<64x32xf32, #tpu.memory_space<any>> -> memref<1x32xf32, #tpu.memory_space<any>>
      %c0_i32_50 = arith.constant 0 : i32
      %112 = tpu.memref_slice %arg9[%110, %c0_i32_50] : memref<16x32xf32, #tpu.memory_space<vmem>> -> memref<1x32xf32, #tpu.memory_space<vmem>>
      %113 = tpu.memref_slice %arg10[%9] : memref<2x!tpu.dma_semaphore, #tpu.memory_space<semaphore_mem>> -> memref<1x!tpu.dma_semaphore, #tpu.memory_space<semaphore_mem>>
      %114 = tpu.memref_squeeze %113 : memref<1x!tpu.dma_semaphore, #tpu.memory_space<semaphore_mem>> -> memref<!tpu.dma_semaphore, #tpu.memory_space<semaphore_mem>>
      tpu.wait_dma2 semaphore(%114 : memref<!tpu.dma_semaphore, #tpu.memory_space<semaphore_mem>>) src(%111 : memref<1x32xf32, #tpu.memory_space<any>>) dst(%112 : memref<1x32xf32, #tpu.memory_space<vmem>>)
    } else {
    }
    %c2_i32_16 = arith.constant 2 : i32
    %34 = arith.addi %19, %c2_i32_16 : i32
    %35 = arith.index_cast %34 : i32 to index
    %36 = memref.load %arg2[%35] : memref<16xi32, #tpu.memory_space<smem>>
    %c0_i32_17 = arith.constant 0 : i32
    %37 = arith.cmpi ne, %36, %c0_i32_17 : i32
    %38 = arith.extui %37 : i1 to i32
    %c0_i32_18 = arith.constant 0 : i32
    %39 = arith.cmpi ne, %38, %c0_i32_18 : i32
    scf.if %39 {
      %c0_i32_48 = arith.constant 0 : i32
      %108 = arith.maxsi %36, %c0_i32_48 : i32
      %c63_i32 = arith.constant 63 : i32
      %109 = arith.minsi %108, %c63_i32 : i32
      %110 = arith.addi %21, %c2_i32_16 : i32
      %c0_i32_49 = arith.constant 0 : i32
      %111 = tpu.memref_slice %arg3[%109, %c0_i32_49] : memref<64x32xf32, #tpu.memory_space<any>> -> memref<1x32xf32, #tpu.memory_space<any>>
      %c0_i32_50 = arith.constant 0 : i32
      %112 = tpu.memref_slice %arg9[%110, %c0_i32_50] : memref<16x32xf32, #tpu.memory_space<vmem>> -> memref<1x32xf32, #tpu.memory_space<vmem>>
      %113 = tpu.memref_slice %arg10[%9] : memref<2x!tpu.dma_semaphore, #tpu.memory_space<semaphore_mem>> -> memref<1x!tpu.dma_semaphore, #tpu.memory_space<semaphore_mem>>
      %114 = tpu.memref_squeeze %113 : memref<1x!tpu.dma_semaphore, #tpu.memory_space<semaphore_mem>> -> memref<!tpu.dma_semaphore, #tpu.memory_space<semaphore_mem>>
      tpu.wait_dma2 semaphore(%114 : memref<!tpu.dma_semaphore, #tpu.memory_space<semaphore_mem>>) src(%111 : memref<1x32xf32, #tpu.memory_space<any>>) dst(%112 : memref<1x32xf32, #tpu.memory_space<vmem>>)
    } else {
    }
    %c3_i32 = arith.constant 3 : i32
    %40 = arith.addi %19, %c3_i32 : i32
    %41 = arith.index_cast %40 : i32 to index
    %42 = memref.load %arg2[%41] : memref<16xi32, #tpu.memory_space<smem>>
    %c0_i32_19 = arith.constant 0 : i32
    %43 = arith.cmpi ne, %42, %c0_i32_19 : i32
    %44 = arith.extui %43 : i1 to i32
    %c0_i32_20 = arith.constant 0 : i32
    %45 = arith.cmpi ne, %44, %c0_i32_20 : i32
    scf.if %45 {
      %c0_i32_48 = arith.constant 0 : i32
      %108 = arith.maxsi %42, %c0_i32_48 : i32
      %c63_i32 = arith.constant 63 : i32
      %109 = arith.minsi %108, %c63_i32 : i32
      %110 = arith.addi %21, %c3_i32 : i32
      %c0_i32_49 = arith.constant 0 : i32
      %111 = tpu.memref_slice %arg3[%109, %c0_i32_49] : memref<64x32xf32, #tpu.memory_space<any>> -> memref<1x32xf32, #tpu.memory_space<any>>
      %c0_i32_50 = arith.constant 0 : i32
      %112 = tpu.memref_slice %arg9[%110, %c0_i32_50] : memref<16x32xf32, #tpu.memory_space<vmem>> -> memref<1x32xf32, #tpu.memory_space<vmem>>
      %113 = tpu.memref_slice %arg10[%9] : memref<2x!tpu.dma_semaphore, #tpu.memory_space<semaphore_mem>> -> memref<1x!tpu.dma_semaphore, #tpu.memory_space<semaphore_mem>>
      %114 = tpu.memref_squeeze %113 : memref<1x!tpu.dma_semaphore, #tpu.memory_space<semaphore_mem>> -> memref<!tpu.dma_semaphore, #tpu.memory_space<semaphore_mem>>
      tpu.wait_dma2 semaphore(%114 : memref<!tpu.dma_semaphore, #tpu.memory_space<semaphore_mem>>) src(%111 : memref<1x32xf32, #tpu.memory_space<any>>) dst(%112 : memref<1x32xf32, #tpu.memory_space<vmem>>)
    } else {
    }
    %c4_i32 = arith.constant 4 : i32
    %46 = arith.addi %19, %c4_i32 : i32
    %47 = arith.index_cast %46 : i32 to index
    %48 = memref.load %arg2[%47] : memref<16xi32, #tpu.memory_space<smem>>
    %c0_i32_21 = arith.constant 0 : i32
    %49 = arith.cmpi ne, %48, %c0_i32_21 : i32
    %50 = arith.extui %49 : i1 to i32
    %c0_i32_22 = arith.constant 0 : i32
    %51 = arith.cmpi ne, %50, %c0_i32_22 : i32
    scf.if %51 {
      %c0_i32_48 = arith.constant 0 : i32
      %108 = arith.maxsi %48, %c0_i32_48 : i32
      %c63_i32 = arith.constant 63 : i32
      %109 = arith.minsi %108, %c63_i32 : i32
      %110 = arith.addi %21, %c4_i32 : i32
      %c0_i32_49 = arith.constant 0 : i32
      %111 = tpu.memref_slice %arg3[%109, %c0_i32_49] : memref<64x32xf32, #tpu.memory_space<any>> -> memref<1x32xf32, #tpu.memory_space<any>>
      %c0_i32_50 = arith.constant 0 : i32
      %112 = tpu.memref_slice %arg9[%110, %c0_i32_50] : memref<16x32xf32, #tpu.memory_space<vmem>> -> memref<1x32xf32, #tpu.memory_space<vmem>>
      %113 = tpu.memref_slice %arg10[%9] : memref<2x!tpu.dma_semaphore, #tpu.memory_space<semaphore_mem>> -> memref<1x!tpu.dma_semaphore, #tpu.memory_space<semaphore_mem>>
      %114 = tpu.memref_squeeze %113 : memref<1x!tpu.dma_semaphore, #tpu.memory_space<semaphore_mem>> -> memref<!tpu.dma_semaphore, #tpu.memory_space<semaphore_mem>>
      tpu.wait_dma2 semaphore(%114 : memref<!tpu.dma_semaphore, #tpu.memory_space<semaphore_mem>>) src(%111 : memref<1x32xf32, #tpu.memory_space<any>>) dst(%112 : memref<1x32xf32, #tpu.memory_space<vmem>>)
    } else {
    }
    %c5_i32 = arith.constant 5 : i32
    %52 = arith.addi %19, %c5_i32 : i32
    %53 = arith.index_cast %52 : i32 to index
    %54 = memref.load %arg2[%53] : memref<16xi32, #tpu.memory_space<smem>>
    %c0_i32_23 = arith.constant 0 : i32
    %55 = arith.cmpi ne, %54, %c0_i32_23 : i32
    %56 = arith.extui %55 : i1 to i32
    %c0_i32_24 = arith.constant 0 : i32
    %57 = arith.cmpi ne, %56, %c0_i32_24 : i32
    scf.if %57 {
      %c0_i32_48 = arith.constant 0 : i32
      %108 = arith.maxsi %54, %c0_i32_48 : i32
      %c63_i32 = arith.constant 63 : i32
      %109 = arith.minsi %108, %c63_i32 : i32
      %110 = arith.addi %21, %c5_i32 : i32
      %c0_i32_49 = arith.constant 0 : i32
      %111 = tpu.memref_slice %arg3[%109, %c0_i32_49] : memref<64x32xf32, #tpu.memory_space<any>> -> memref<1x32xf32, #tpu.memory_space<any>>
      %c0_i32_50 = arith.constant 0 : i32
      %112 = tpu.memref_slice %arg9[%110, %c0_i32_50] : memref<16x32xf32, #tpu.memory_space<vmem>> -> memref<1x32xf32, #tpu.memory_space<vmem>>
      %113 = tpu.memref_slice %arg10[%9] : memref<2x!tpu.dma_semaphore, #tpu.memory_space<semaphore_mem>> -> memref<1x!tpu.dma_semaphore, #tpu.memory_space<semaphore_mem>>
      %114 = tpu.memref_squeeze %113 : memref<1x!tpu.dma_semaphore, #tpu.memory_space<semaphore_mem>> -> memref<!tpu.dma_semaphore, #tpu.memory_space<semaphore_mem>>
      tpu.wait_dma2 semaphore(%114 : memref<!tpu.dma_semaphore, #tpu.memory_space<semaphore_mem>>) src(%111 : memref<1x32xf32, #tpu.memory_space<any>>) dst(%112 : memref<1x32xf32, #tpu.memory_space<vmem>>)
    } else {
    }
    %c6_i32 = arith.constant 6 : i32
    %58 = arith.addi %19, %c6_i32 : i32
    %59 = arith.index_cast %58 : i32 to index
    %60 = memref.load %arg2[%59] : memref<16xi32, #tpu.memory_space<smem>>
    %c0_i32_25 = arith.constant 0 : i32
    %61 = arith.cmpi ne, %60, %c0_i32_25 : i32
    %62 = arith.extui %61 : i1 to i32
    %c0_i32_26 = arith.constant 0 : i32
    %63 = arith.cmpi ne, %62, %c0_i32_26 : i32
    scf.if %63 {
      %c0_i32_48 = arith.constant 0 : i32
      %108 = arith.maxsi %60, %c0_i32_48 : i32
      %c63_i32 = arith.constant 63 : i32
      %109 = arith.minsi %108, %c63_i32 : i32
      %110 = arith.addi %21, %c6_i32 : i32
      %c0_i32_49 = arith.constant 0 : i32
      %111 = tpu.memref_slice %arg3[%109, %c0_i32_49] : memref<64x32xf32, #tpu.memory_space<any>> -> memref<1x32xf32, #tpu.memory_space<any>>
      %c0_i32_50 = arith.constant 0 : i32
      %112 = tpu.memref_slice %arg9[%110, %c0_i32_50] : memref<16x32xf32, #tpu.memory_space<vmem>> -> memref<1x32xf32, #tpu.memory_space<vmem>>
      %113 = tpu.memref_slice %arg10[%9] : memref<2x!tpu.dma_semaphore, #tpu.memory_space<semaphore_mem>> -> memref<1x!tpu.dma_semaphore, #tpu.memory_space<semaphore_mem>>
      %114 = tpu.memref_squeeze %113 : memref<1x!tpu.dma_semaphore, #tpu.memory_space<semaphore_mem>> -> memref<!tpu.dma_semaphore, #tpu.memory_space<semaphore_mem>>
      tpu.wait_dma2 semaphore(%114 : memref<!tpu.dma_semaphore, #tpu.memory_space<semaphore_mem>>) src(%111 : memref<1x32xf32, #tpu.memory_space<any>>) dst(%112 : memref<1x32xf32, #tpu.memory_space<vmem>>)
    } else {
    }
    %c7_i32 = arith.constant 7 : i32
    %64 = arith.addi %19, %c7_i32 : i32
    %65 = arith.index_cast %64 : i32 to index
    %66 = memref.load %arg2[%65] : memref<16xi32, #tpu.memory_space<smem>>
    %c0_i32_27 = arith.constant 0 : i32
    %67 = arith.cmpi ne, %66, %c0_i32_27 : i32
    %68 = arith.extui %67 : i1 to i32
    %c0_i32_28 = arith.constant 0 : i32
    %69 = arith.cmpi ne, %68, %c0_i32_28 : i32
    scf.if %69 {
      %c0_i32_48 = arith.constant 0 : i32
      %108 = arith.maxsi %66, %c0_i32_48 : i32
      %c63_i32 = arith.constant 63 : i32
      %109 = arith.minsi %108, %c63_i32 : i32
      %110 = arith.addi %21, %c7_i32 : i32
      %c0_i32_49 = arith.constant 0 : i32
      %111 = tpu.memref_slice %arg3[%109, %c0_i32_49] : memref<64x32xf32, #tpu.memory_space<any>> -> memref<1x32xf32, #tpu.memory_space<any>>
      %c0_i32_50 = arith.constant 0 : i32
      %112 = tpu.memref_slice %arg9[%110, %c0_i32_50] : memref<16x32xf32, #tpu.memory_space<vmem>> -> memref<1x32xf32, #tpu.memory_space<vmem>>
      %113 = tpu.memref_slice %arg10[%9] : memref<2x!tpu.dma_semaphore, #tpu.memory_space<semaphore_mem>> -> memref<1x!tpu.dma_semaphore, #tpu.memory_space<semaphore_mem>>
      %114 = tpu.memref_squeeze %113 : memref<1x!tpu.dma_semaphore, #tpu.memory_space<semaphore_mem>> -> memref<!tpu.dma_semaphore, #tpu.memory_space<semaphore_mem>>
      tpu.wait_dma2 semaphore(%114 : memref<!tpu.dma_semaphore, #tpu.memory_space<semaphore_mem>>) src(%111 : memref<1x32xf32, #tpu.memory_space<any>>) dst(%112 : memref<1x32xf32, #tpu.memory_space<vmem>>)
    } else {
    }
    %c8_i32_29 = arith.constant 8 : i32
    %c8_i32_30 = arith.constant 8 : i32
    %70 = arith.muli %9, %c8_i32_30 : i32
    %71 = tpu.assume_multiple %70, 8 : i32
    %72 = arith.index_cast %71 : i32 to index
    %c0 = arith.constant 0 : index
    %73 = vector.load %arg9[%72, %c0] : memref<16x32xf32, #tpu.memory_space<vmem>>, vector<8x32xf32>
    %c0_31 = arith.constant 0 : index
    %c0_32 = arith.constant 0 : index
    %74 = vector.load %arg4[%c0_31, %c0_32] : memref<8x32xf32, #tpu.memory_space<vmem>>, vector<8x32xf32>
    %75 = arith.addf %73, %74 : vector<8x32xf32>
    %cst = arith.constant dense<0.000000e+00> : vector<8xf32>
    %76 = vector.multi_reduction <add>, %75, %cst [1] : vector<8x32xf32> to vector<8xf32>
    %77 = vector.shape_cast %76 : vector<8xf32> to vector<8x1xf32>
    %78 = arith.mulf %75, %75 : vector<8x32xf32>
    %cst_33 = arith.constant dense<0.000000e+00> : vector<8xf32>
    %79 = vector.multi_reduction <add>, %78, %cst_33 [1] : vector<8x32xf32> to vector<8xf32>
    %80 = vector.shape_cast %79 : vector<8xf32> to vector<8x1xf32>
    %cst_34 = arith.constant 3.125000e-02 : f32
    %81 = vector.broadcast %cst_34 : f32 to vector<8x1xf32>
    %82 = arith.mulf %77, %81 : vector<8x1xf32>
    %cst_35 = arith.constant 3.125000e-02 : f32
    %83 = vector.broadcast %cst_35 : f32 to vector<8x1xf32>
    %84 = arith.mulf %80, %83 : vector<8x1xf32>
    %85 = arith.mulf %82, %82 : vector<8x1xf32>
    %86 = arith.subf %84, %85 : vector<8x1xf32>
    %cst_36 = arith.constant 0.000000e+00 : f32
    %87 = vector.broadcast %cst_36 : f32 to vector<8x1xf32>
    %88 = arith.maximumf %86, %87 : vector<8x1xf32>
    %89 = vector.broadcast %82 : vector<8x1xf32> to vector<8x32xf32>
    %90 = arith.subf %75, %89 : vector<8x32xf32>
    %cst_37 = arith.constant 9.99999993E-9 : f32
    %91 = vector.broadcast %cst_37 : f32 to vector<8x1xf32>
    %92 = arith.addf %88, %91 : vector<8x1xf32>
    %93 = math.rsqrt %92 : vector<8x1xf32>
    %94 = vector.broadcast %93 : vector<8x1xf32> to vector<8x32xf32>
    %95 = arith.mulf %90, %94 : vector<8x32xf32>
    %c0_38 = arith.constant 0 : index
    %c0_39 = arith.constant 0 : index
    %96 = vector.load %arg5[%c0_38, %c0_39] : memref<1x32xf32, #tpu.memory_space<vmem>>, vector<1x32xf32>
    %97 = vector.broadcast %96 : vector<1x32xf32> to vector<8x32xf32>
    %98 = arith.mulf %95, %97 : vector<8x32xf32>
    %c0_40 = arith.constant 0 : index
    %c0_41 = arith.constant 0 : index
    %99 = vector.load %arg6[%c0_40, %c0_41] : memref<1x32xf32, #tpu.memory_space<vmem>>, vector<1x32xf32>
    %100 = vector.broadcast %99 : vector<1x32xf32> to vector<8x32xf32>
    %101 = arith.addf %98, %100 : vector<8x32xf32>
    %c0_42 = arith.constant 0 : index
    %c0_43 = arith.constant 0 : index
    %c0_44 = arith.constant 0 : index
    %102 = vector.load %arg7[%c0_42, %c0_43, %c0_44] : memref<1x8x1xf32, #tpu.memory_space<vmem>>, vector<1x8x1xf32>
    %103 = vector.shape_cast %102 : vector<1x8x1xf32> to vector<8x1xf32>
    %104 = vector.broadcast %103 : vector<8x1xf32> to vector<8x32xf32>
    %105 = arith.mulf %101, %104 : vector<8x32xf32>
    %106 = vector.shape_cast %105 : vector<8x32xf32> to vector<1x8x32xf32>
    %c0_45 = arith.constant 0 : index
    %c0_46 = arith.constant 0 : index
    %c0_47 = arith.constant 0 : index
    %107 = vector.load %arg8[%c0_45, %c0_46, %c0_47] : memref<1x8x32xf32, #tpu.memory_space<vmem>>, vector<1x8x32xf32>
    tpu.vector_store %arg8[%c0_45, %c0_46, %c0_47], %106 {strides = array<i32>} : memref<1x8x32xf32, #tpu.memory_space<vmem>>, vector<1x8x32xf32>,
    return
  }
  func.func @transform_1(%arg0: i32, %arg1: i32, %arg2: memref<16xi32, #tpu.memory_space<smem>>) -> (i32, i32) {
    %c0_i32 = arith.constant 0 : i32
    %c0_i32_0 = arith.constant 0 : i32
    return %arg0, %c0_i32 : i32, i32
  }
  func.func @transform_2(%arg0: i32, %arg1: i32, %arg2: memref<16xi32, #tpu.memory_space<smem>>) -> (i32, i32) {
    %c0_i32 = arith.constant 0 : i32
    %c0_i32_0 = arith.constant 0 : i32
    %c0_i32_1 = arith.constant 0 : i32
    return %c0_i32, %c0_i32_0 : i32, i32
  }
  func.func @transform_3(%arg0: i32, %arg1: i32, %arg2: memref<16xi32, #tpu.memory_space<smem>>) -> (i32, i32) {
    %c0_i32 = arith.constant 0 : i32
    %c0_i32_0 = arith.constant 0 : i32
    %c0_i32_1 = arith.constant 0 : i32
    return %c0_i32, %c0_i32_0 : i32, i32
  }
  func.func @transform_4(%arg0: i32, %arg1: i32, %arg2: memref<16xi32, #tpu.memory_space<smem>>) -> (i32, i32, i32) {
    %c0_i32 = arith.constant 0 : i32
    %c0_i32_0 = arith.constant 0 : i32
    return %arg1, %arg0, %c0_i32 : i32, i32, i32
  }
  func.func @transform_5(%arg0: i32, %arg1: i32, %arg2: memref<16xi32, #tpu.memory_space<smem>>) -> (i32, i32, i32) {
    %c0_i32 = arith.constant 0 : i32
    %c0_i32_0 = arith.constant 0 : i32
    return %arg1, %arg0, %c0_i32 : i32, i32, i32
  }
}

</mosaic_0001>

<bundles_post_ra>
// kernel: tpu_custom_call.1
= control target key start
LH: loop header
LB: loop body
LE: loop exit
PB: predicated region body
PF: predicated region fallthrough
CT: control target
= control target key end

     0   :  { %s2713_s0 = inlined_call_operand.vmem [shape: s32[16], index: 0, kind: input, shape index: {}]   ;;  %s2714_s1 = inlined_call_operand.vmem [shape: f32[64,32], index: 1, kind: input, shape index: {}]   ;;  %s2715_s2 = inlined_call_operand.vmem [shape: f32[16,32], index: 2, kind: input, shape index: {}]   ;;  %s2716_s3 = inlined_call_operand.vmem [shape: f32[1,32], index: 3, kind: input, shape index: {}]   ;;  %s2717_s4 = inlined_call_operand.vmem [shape: f32[1,32], index: 4, kind: input, shape index: {}]   ;;  %s2718_s5 = inlined_call_operand.vmem [shape: f32[2,8,1], index: 5, kind: input, shape index: {}]   ;;  %s2719_s6 = inlined_call_operand.hbm [shape: f32[2,8,32], index: 6, kind: output, shape index: {}]  }
   0x1   :  { %2721 = sst [smem:[#allocation34_spill]] %s2718_s5  ;;  %s11_s23 = sshll.u32 %s2713_s0, 4  ;;  %s12_s23 = int_to_ptr.vmem [resolvable:$true] %s11_s23 }
   0x2   :  { %s2225_s24 = scalar_lea.vmem %s12_s23, 16  ;;  %p2230_p1 = scmp.lt.s32.totalorder %s12_s23, %s12_s23 }
   0x3   :  { %p2226_p0 = scmp.ne.s32.totalorder %s12_s23, %s2225_s24  ;;  %p2231_p2 = scmp.lt.s32.totalorder %s2225_s24, %s2225_s24 }
   0x5   :  { %p2232_p3 = por %p2231_p2, %p2230_p1 }
   0x7   :  { %p2233_p4 = pnand %p2232_p3, %p2226_p0 }
   0x9   :  { %2236 = shalt.err (!%p2233_p4)  }
   0xa   :  { %s2351_s25 = smov [#allocation5]  }
   0xb   :  { %14 = dma.vmem_to_smem %s12_s23, 16, %s2351_s25, [#allocation4] }
   0xc   :  { %2289 = dma.done.wait [#allocation4], 16 }
   0xd   :  { %2290 = vsyncadd [#allocation4], 4294967280 }
   0xe   :  { %16 = sfence }
   0xf   :  { %17 = vsyncpa [#allocation7], 0 }
  0x10   :  { %19 = vsyncpa [#allocation7 + $0x1], 0  ;;  %s2408_s26 = smov 0   ;;  %s2410_s27 = smov 0  }
  0x11   :  { %s2412_s0 = smov 0   ;;  %s2414_s28 = smov 0  }
  0x12   :  { %s2416_s29 = smov 0   ;;  %s2418_s30 = smov 0  }
  0x13 LB: > { %s1873_s7 = sadd.s32 4294967295, %s2349_s30   ;;  %s1874_s8 = sadd.s32 4294967294, %s2349_s30   ;;  %s2349_s30 = sphi %s2418_s30, %s25_s30   ;;  %s2345_s29 = sphi %s2416_s29, %s2732_s29   ;;  %s2341_s28 = sphi %s2414_s28, %s2731_s28   ;;  %s2337_s0 = sphi %s2412_s0, %s2730_s0   ;;  %s2333_s27 = sphi %s2410_s27, %s2729_s27   ;;  %s2329_s26 = sphi %s2408_s26, %s2728_s26  }
  0x14   : > { %s34_s9 = sadd.s32 1, %s2345_s29  ;;  %s142_s10 = sadd.s32 1, %s2337_s0 }
  0x15   : > { %p35_p5 = scmp.ge.s32.totalorder %s34_s9, 2  ;;  %p152_p6 = scmp.ne.s32.totalorder %s2337_s0, %s2333_s27 }
  0x16   : > { %p153_p7 = scmp.eq.s32.totalorder %s1873_s7, 1  ;;  %p158_p8 = scmp.ne.s32.totalorder %s2333_s27, %s2329_s26 }
  0x17   : > { %s2734_s9 = smov (%p35_p5, %s34_s9), 0  ;;  %p159_p10 = scmp.eq.s32.totalorder %s1874_s8, 1 }
  0x18   : > { %p2448_p9 = por %p153_p7, %p152_p6  ;;  %s137_s12 = ssub.s32 %s2345_s29, %s2734_s9 }
  0x19   : > { %p1878_p11 = scmp.ge.s32.totalorder %s2349_s30, 1  ;;  %p140_p12 = scmp.eq.s32.totalorder %s137_s12, 0 }
  0x1a   : > { %p2455_p13 = por %p159_p10, %p158_p8  ;;  %p200_p0 = scmp.lt.s32.totalorder %s2349_s30, 3 }
  0x1b   : > { %s2461_s14 = scalar_select %p140_p12, %s2337_s0, %s142_s10  }
  0x1c   : > { %p201_p1 = pnand %p1878_p11, %p200_p0 }
  0x1d   : > { %s2720_s15 = sand.u32 (!%p201_p1), 1, %s2333_s27   ;;  %p236_p2 = scmp.lt.s32.totalorder (!%p201_p1), %s2341_s28, 1 }
  0x1e   : > { %204 = sbr.rel (%p201_p1) target bundleno = 828 (0x33c), region = 36  ;;  %s2467_s16 = sshll.u32 (!%p201_p1), %s2720_s15, 3 }
  0x1f   : > { %p243_p3 = scmp.lt.s32.totalorder (!%p201_p1), %s2341_s28, 0  ;;  %s244_s17 = ssub.s32 (!%p201_p1), 0, %s2341_s28 }
  0x20   : > { %s1881_s19 = smin.u32 (!%p201_p1), %s2341_s28, %s244_s17  ;;  %s2724_s5 = sld [smem:[#allocation34_spill]] (!%p201_p1) }
  0x21   : > { %s246_s21 = sand.u32 (!%p201_p1), 1, %s1881_s19   ;;  %p1884_p5 = scmp.ne.s32.totalorder (!%p201_p1), %s2341_s28, 0 }
  0x22   : > { %s247_s25 = ssub.s32 (!%p201_p1), 0, %s246_s21 }
  0x25   : > { %s237_s18 = scalar_select %p236_p2, %s2341_s28, 1 }
  0x26   : > { %s2736_s25 = smov (!%p243_p3, %s247_s25), %s246_s21  ;;  %258 = sbr.rel (%p1884_p5) target bundleno = 297 (0x129), region = 40 }
  0x27   : > { %s1880_s20 = sshll.u32 %s237_s18, 3  ;;  %p1883_p4 = scmp.lt.s32.totalorder %s2736_s25, 0 }
  0x28   : > { %s2476_s24 = scalar_lea.vmem %s2724_s5, %s1880_s20  ;;  %s253_s7 = sadd.s32 2, %s2736_s25 }
  0x29   : > { %s2738_s7 = smov (!%p1883_p4, %s253_s7), %s2736_s25  ;;  %s2483_s10 = sshll.u32 (!%p1884_p5), %s2341_s28, 3 }
  0x2a   : > { %s2486_s12 = sshll.u32 (!%p1884_p5), %s2738_s7, 3  ;;  %s263_s17 = sld [smem:[#allocation5 + %s2483_s10]] (!%p1884_p5) }
  0x30   : > { %p1887_p6 = scmp.eq.s32.totalorder %s263_s17, 0 }
  0x31   : > { %p268_p7 = scmp.gt.s32.totalorder (!%p1887_p6), %s263_s17, 0  ;;  %p1888_p8 = scmp.lt.s32.totalorder (!%p1887_p6), %s263_s17, 63 }
  0x32   : > { %267 = sbr.rel (%p1887_p6) target bundleno = 64 (0x40), region = 44  ;;  %s273_s22 = scalar_lea.vmem (!%p1887_p6), [#allocation2], %s2486_s12 }
  0x33   : > { %s274_s23 = scalar_lea.sflag (!%p1887_p6), [#allocation3], %s2738_s7 }
  0x39   : > { %s269_s18 = scalar_select %p268_p7, %s263_s17, 0 }
  0x3b   : > { %s2740_s18 = smov (!%p1888_p8, %s269_s18), 63 }
  0x3c   : > { %s272_s21 = scalar_lea.vmem %s2714_s1, %s2740_s18 }
  0x3d   : > { %v292_v0 = vld [vmem:[%s272_s21] sm:$0x1] }
  0x3e   : > { %293 = vst [vmem:[%s273_s22] sm:$0x1] %v292_v0 }
  0x3f   : > { %318 = vsyncadd %s274_s23, 16 }
  0x40 PF: > { %p1893_p10 = scmp.ne.s32.totalorder %s263_s17, 0 }
  0x41   : > { %vm324_vm0 = vcmask (!%p1893_p10), 253952   ;;  %s323_s25 = scalar_lea.vmem (!%p1893_p10), [#allocation2], %s2486_s12  ;;  %v2352_v1 = vmov (!%p1893_p10), 0.0  }
  0x42   : > { %322 = sbr.rel (%p1893_p10) target bundleno = 73 (0x49), region = 78  ;;  %325 = vst.msk [vmem:[%s323_s25] sm:$0x1] (!%p1893_p10), %vm324_vm0, %v2352_v1 }
  0x49 PF: > { %s326_s15 = sadd.s32 1, %s2483_s10 }
  0x4a   : > { %s327_s8 = sld [smem:[#allocation5 + %s326_s15]] }
  0x50   : > { %p1894_p11 = scmp.eq.s32.totalorder %s327_s8, 0 }
  0x51   : > { %p332_p12 = scmp.gt.s32.totalorder (!%p1894_p11), %s327_s8, 0  ;;  %p1895_p0 = scmp.lt.s32.totalorder (!%p1894_p11), %s327_s8, 63 }
  0x52   : > { %331 = sbr.rel (%p1894_p11) target bundleno = 96 (0x60), region = 82  ;;  %s1528_s21 = scalar_lea.vmem (!%p1894_p11), [#allocation2], %s2486_s12 }
  0x53   : > { %s339_s22 = scalar_lea.sflag (!%p1894_p11), [#allocation3], %s2738_s7 }
  0x59   : > { %s333_s18 = scalar_select %p332_p12, %s327_s8, 0 }
  0x5b   : > { %s2742_s18 = smov (!%p1895_p0, %s333_s18), 63 }
  0x5c   : > { %s337_s20 = scalar_lea.vmem %s2714_s1, %s2742_s18 }
  0x5d   : > { %v357_v2 = vld [vmem:[%s337_s20] sm:$0x1] }
  0x5e   : > { %1902 = vst [vmem:[%s1528_s21 + $0x1] sm:$0x1] %v357_v2 }
  0x5f   : > { %383 = vsyncadd %s339_s22, 16 }
  0x60 PF: > { %p1903_p1 = scmp.ne.s32.totalorder %s327_s8, 0 }
  0x61   : > { %vm390_vm1 = vcmask (!%p1903_p1), 253952   ;;  %s1535_s15 = scalar_lea.vmem (!%p1903_p1), [#allocation2], %s2486_s12  ;;  %v2353_v3 = vmov (!%p1903_p1), 0.0  }
  0x62   : > { %387 = sbr.rel (%p1903_p1) target bundleno = 105 (0x69), region = 116  ;;  %1905 = vst.msk [vmem:[%s1535_s15 + $0x1] sm:$0x1] (!%p1903_p1), %vm390_vm1, %v2353_v3 }
  0x69 PF: > { %s392_s23 = sadd.s32 2, %s2483_s10 }
  0x6a   : > { %s393_s25 = sld [smem:[#allocation5 + %s392_s23]] }
  0x70   : > { %p1906_p2 = scmp.eq.s32.totalorder %s393_s25, 0 }
  0x71   : > { %p398_p3 = scmp.gt.s32.totalorder (!%p1906_p2), %s393_s25, 0  ;;  %p1907_p4 = scmp.lt.s32.totalorder (!%p1906_p2), %s393_s25, 63 }
  0x72   : > { %397 = sbr.rel (%p1906_p2) target bundleno = 128 (0x80), region = 120  ;;  %s1539_s20 = scalar_lea.vmem (!%p1906_p2), [#allocation2], %s2486_s12 }
  0x73   : > { %s405_s21 = scalar_lea.sflag (!%p1906_p2), [#allocation3], %s2738_s7 }
  0x79   : > { %s399_s18 = scalar_select %p398_p3, %s393_s25, 0 }
  0x7b   : > { %s2744_s18 = smov (!%p1907_p4, %s399_s18), 63 }
  0x7c   : > { %s403_s17 = scalar_lea.vmem %s2714_s1, %s2744_s18 }
  0x7d   : > { %v423_v4 = vld [vmem:[%s403_s17] sm:$0x1] }
  0x7e   : > { %1914 = vst [vmem:[%s1539_s20 + $0x2] sm:$0x1] %v423_v4 }
  0x7f   : > { %449 = vsyncadd %s405_s21, 16 }
  0x80 PF: > { %p1915_p5 = scmp.ne.s32.totalorder %s393_s25, 0 }
  0x81   : > { %vm456_vm2 = vcmask (!%p1915_p5), 253952   ;;  %s1546_s22 = scalar_lea.vmem (!%p1915_p5), [#allocation2], %s2486_s12  ;;  %v2354_v5 = vmov (!%p1915_p5), 0.0  }
  0x82   : > { %453 = sbr.rel (%p1915_p5) target bundleno = 137 (0x89), region = 154  ;;  %1917 = vst.msk [vmem:[%s1546_s22 + $0x2] sm:$0x1] (!%p1915_p5), %vm456_vm2, %v2354_v5 }
  0x89 PF: > { %s458_s15 = sadd.s32 3, %s2483_s10 }
  0x8a   : > { %s459_s23 = sld [smem:[#allocation5 + %s458_s15]] }
  0x90   : > { %p1918_p6 = scmp.eq.s32.totalorder %s459_s23, 0 }
  0x91   : > { %p464_p7 = scmp.gt.s32.totalorder (!%p1918_p6), %s459_s23, 0  ;;  %p1919_p8 = scmp.lt.s32.totalorder (!%p1918_p6), %s459_s23, 63 }
  0x92   : > { %463 = sbr.rel (%p1918_p6) target bundleno = 160 (0xa0), region = 158  ;;  %s1550_s17 = scalar_lea.vmem (!%p1918_p6), [#allocation2], %s2486_s12 }
  0x93   : > { %s471_s20 = scalar_lea.sflag (!%p1918_p6), [#allocation3], %s2738_s7 }
  0x99   : > { %s465_s18 = scalar_select %p464_p7, %s459_s23, 0 }
  0x9b   : > { %s2746_s18 = smov (!%p1919_p8, %s465_s18), 63 }
  0x9c   : > { %s469_s8 = scalar_lea.vmem %s2714_s1, %s2746_s18 }
  0x9d   : > { %v489_v6 = vld [vmem:[%s469_s8] sm:$0x1] }
  0x9e   : > { %1926 = vst [vmem:[%s1550_s17 + $0x3] sm:$0x1] %v489_v6 }
  0x9f   : > { %515 = vsyncadd %s471_s20, 16 }
  0xa0 PF: > { %p1927_p10 = scmp.ne.s32.totalorder %s459_s23, 0 }
  0xa1   : > { %vm522_vm3 = vcmask (!%p1927_p10), 253952   ;;  %s1557_s21 = scalar_lea.vmem (!%p1927_p10), [#allocation2], %s2486_s12  ;;  %v2355_v7 = vmov (!%p1927_p10), 0.0  }
  0xa2   : > { %519 = sbr.rel (%p1927_p10) target bundleno = 169 (0xa9), region = 192  ;;  %1929 = vst.msk [vmem:[%s1557_s21 + $0x3] sm:$0x1] (!%p1927_p10), %vm522_vm3, %v2355_v7 }
  0xa9 PF: > { %s524_s22 = sadd.s32 4, %s2483_s10 }
  0xaa   : > { %s525_s15 = sld [smem:[#allocation5 + %s524_s22]] }
  0xb0   : > { %p1930_p11 = scmp.eq.s32.totalorder %s525_s15, 0 }
  0xb1   : > { %p530_p12 = scmp.gt.s32.totalorder (!%p1930_p11), %s525_s15, 0  ;;  %p1931_p0 = scmp.lt.s32.totalorder (!%p1930_p11), %s525_s15, 63 }
  0xb2   : > { %529 = sbr.rel (%p1930_p11) target bundleno = 192 (0xc0), region = 196  ;;  %s1561_s8 = scalar_lea.vmem (!%p1930_p11), [#allocation2], %s2486_s12 }
  0xb3   : > { %s537_s17 = scalar_lea.sflag (!%p1930_p11), [#allocation3], %s2738_s7 }
  0xb9   : > { %s531_s18 = scalar_select %p530_p12, %s525_s15, 0 }
  0xbb   : > { %s2748_s18 = smov (!%p1931_p0, %s531_s18), 63 }
  0xbc   : > { %s535_s25 = scalar_lea.vmem %s2714_s1, %s2748_s18 }
  0xbd   : > { %v555_v8 = vld [vmem:[%s535_s25] sm:$0x1] }
  0xbe   : > { %1938 = vst [vmem:[%s1561_s8 + $0x4] sm:$0x1] %v555_v8 }
  0xbf   : > { %581 = vsyncadd %s537_s17, 16 }
  0xc0 PF: > { %p1939_p1 = scmp.ne.s32.totalorder %s525_s15, 0 }
  0xc1   : > { %vm588_vm4 = vcmask (!%p1939_p1), 253952   ;;  %s1568_s20 = scalar_lea.vmem (!%p1939_p1), [#allocation2], %s2486_s12  ;;  %v2356_v9 = vmov (!%p1939_p1), 0.0  }
  0xc2   : > { %585 = sbr.rel (%p1939_p1) target bundleno = 201 (0xc9), region = 230  ;;  %1941 = vst.msk [vmem:[%s1568_s20 + $0x4] sm:$0x1] (!%p1939_p1), %vm588_vm4, %v2356_v9 }
  0xc9 PF: > { %s590_s21 = sadd.s32 5, %s2483_s10 }
  0xca   : > { %s591_s22 = sld [smem:[#allocation5 + %s590_s21]] }
  0xd0   : > { %p1942_p2 = scmp.eq.s32.totalorder %s591_s22, 0 }
  0xd1   : > { %p596_p3 = scmp.gt.s32.totalorder (!%p1942_p2), %s591_s22, 0  ;;  %p1943_p4 = scmp.lt.s32.totalorder (!%p1942_p2), %s591_s22, 63 }
  0xd2   : > { %595 = sbr.rel (%p1942_p2) target bundleno = 224 (0xe0), region = 234  ;;  %s1572_s25 = scalar_lea.vmem (!%p1942_p2), [#allocation2], %s2486_s12 }
  0xd3   : > { %s603_s8 = scalar_lea.sflag (!%p1942_p2), [#allocation3], %s2738_s7 }
  0xd9   : > { %s597_s18 = scalar_select %p596_p3, %s591_s22, 0 }
  0xdb   : > { %s2750_s18 = smov (!%p1943_p4, %s597_s18), 63 }
  0xdc   : > { %s601_s23 = scalar_lea.vmem %s2714_s1, %s2750_s18 }
  0xdd   : > { %v621_v10 = vld [vmem:[%s601_s23] sm:$0x1] }
  0xde   : > { %1950 = vst [vmem:[%s1572_s25 + $0x5] sm:$0x1] %v621_v10 }
  0xdf   : > { %647 = vsyncadd %s603_s8, 16 }
  0xe0 PF: > { %p1951_p5 = scmp.ne.s32.totalorder %s591_s22, 0 }
  0xe1   : > { %vm654_vm5 = vcmask (!%p1951_p5), 253952   ;;  %s1579_s17 = scalar_lea.vmem (!%p1951_p5), [#allocation2], %s2486_s12  ;;  %v2357_v11 = vmov (!%p1951_p5), 0.0  }
  0xe2   : > { %651 = sbr.rel (%p1951_p5) target bundleno = 233 (0xe9), region = 268  ;;  %1953 = vst.msk [vmem:[%s1579_s17 + $0x5] sm:$0x1] (!%p1951_p5), %vm654_vm5, %v2357_v11 }
  0xe9 PF: > { %s656_s20 = sadd.s32 6, %s2483_s10 }
  0xea   : > { %s657_s21 = sld [smem:[#allocation5 + %s656_s20]] }
  0xf0   : > { %p1954_p6 = scmp.eq.s32.totalorder %s657_s21, 0 }
  0xf1   : > { %p662_p7 = scmp.gt.s32.totalorder (!%p1954_p6), %s657_s21, 0  ;;  %p1955_p8 = scmp.lt.s32.totalorder (!%p1954_p6), %s657_s21, 63 }
  0xf2   : > { %661 = sbr.rel (%p1954_p6) target bundleno = 256 (0x100), region = 272  ;;  %s1583_s23 = scalar_lea.vmem (!%p1954_p6), [#allocation2], %s2486_s12 }
  0xf3   : > { %s669_s25 = scalar_lea.sflag (!%p1954_p6), [#allocation3], %s2738_s7 }
  0xf9   : > { %s663_s18 = scalar_select %p662_p7, %s657_s21, 0 }
  0xfb   : > { %s2752_s18 = smov (!%p1955_p8, %s663_s18), 63 }
  0xfc   : > { %s667_s15 = scalar_lea.vmem %s2714_s1, %s2752_s18 }
  0xfd   : > { %v687_v12 = vld [vmem:[%s667_s15] sm:$0x1] }
  0xfe   : > { %1962 = vst [vmem:[%s1583_s23 + $0x6] sm:$0x1] %v687_v12 }
  0xff   : > { %713 = vsyncadd %s669_s25, 16 }
 0x100 PF: > { %p1963_p10 = scmp.ne.s32.totalorder %s657_s21, 0 }
 0x101   : > { %vm720_vm6 = vcmask (!%p1963_p10), 253952   ;;  %s1590_s8 = scalar_lea.vmem (!%p1963_p10), [#allocation2], %s2486_s12  ;;  %v2358_v13 = vmov (!%p1963_p10), 0.0  }
 0x102   : > { %717 = sbr.rel (%p1963_p10) target bundleno = 265 (0x109), region = 306  ;;  %1965 = vst.msk [vmem:[%s1590_s8 + $0x6] sm:$0x1] (!%p1963_p10), %vm720_vm6, %v2358_v13 }
 0x109 PF: > { %s722_s17 = sadd.s32 7, %s2483_s10 }
 0x10a   : > { %s723_s20 = sld [smem:[#allocation5 + %s722_s17]] }
 0x110   : > { %p1966_p11 = scmp.eq.s32.totalorder %s723_s20, 0 }
 0x111   : > { %p728_p12 = scmp.gt.s32.totalorder (!%p1966_p11), %s723_s20, 0  ;;  %p1967_p0 = scmp.lt.s32.totalorder (!%p1966_p11), %s723_s20, 63 }
 0x112   : > { %727 = sbr.rel (%p1966_p11) target bundleno = 288 (0x120), region = 310  ;;  %s1594_s15 = scalar_lea.vmem (!%p1966_p11), [#allocation2], %s2486_s12 }
 0x113   : > { %s735_s23 = scalar_lea.sflag (!%p1966_p11), [#allocation3], %s2738_s7 }
 0x119   : > { %s729_s18 = scalar_select %p728_p12, %s723_s20, 0 }
 0x11b   : > { %s2754_s18 = smov (!%p1967_p0, %s729_s18), 63 }
 0x11c   : > { %s733_s22 = scalar_lea.vmem %s2714_s1, %s2754_s18 }
 0x11d   : > { %v753_v14 = vld [vmem:[%s733_s22] sm:$0x1] }
 0x11e   : > { %1974 = vst [vmem:[%s1594_s15 + $0x7] sm:$0x1] %v753_v14 }
 0x11f   : > { %779 = vsyncadd %s735_s23, 16 }
 0x120 PF: > { %p1975_p1 = scmp.ne.s32.totalorder %s723_s20, 0 }
 0x121   : > { %vm786_vm7 = vcmask (!%p1975_p1), 253952   ;;  %s1601_s10 = scalar_lea.vmem (!%p1975_p1), [#allocation2], %s2486_s12  ;;  %v2359_v15 = vmov (!%p1975_p1), 0.0  }
 0x122   : > { %783 = sbr.rel (%p1975_p1) target bundleno = 297 (0x129), region = 344  ;;  %1977 = vst.msk [vmem:[%s1601_s10 + $0x7] sm:$0x1] (!%p1975_p1), %vm786_vm7, %v2359_v15 }
 0x129 PF: > { %s788_s25 = sadd.s32 1, %s2341_s28 }
 0x12a   : > { %p1978_p2 = scmp.ge.s32.totalorder %s788_s25, 2 }
 0x12b   : > { %s2546_s8 = ssub.s32 (!%p1978_p2), 1, %s2738_s7  ;;  %s2106_s17 = sshll.u32 (!%p1978_p2), %s2341_s28, 3 }
 0x12c   : > { %792 = sbr.rel (%p1978_p2) target bundleno = 556 (0x22c), region = 348  ;;  %s2549_s18 = sadd.s32 (!%p1978_p2), 8, %s2106_s17 }
 0x12d   : > { %s2552_s20 = sshll.u32 (!%p1978_p2), %s2546_s8, 3  ;;  %s798_s12 = sld [smem:[#allocation5 + %s2549_s18]] (!%p1978_p2) }
 0x133   : > { %p1981_p3 = scmp.eq.s32.totalorder %s798_s12, 0 }
 0x134   : > { %p803_p4 = scmp.gt.s32.totalorder (!%p1981_p3), %s798_s12, 0  ;;  %p1982_p5 = scmp.lt.s32.totalorder (!%p1981_p3), %s798_s12, 63 }
 0x135   : > { %802 = sbr.rel (%p1981_p3) target bundleno = 323 (0x143), region = 352  ;;  %s808_s23 = scalar_lea.vmem (!%p1981_p3), [#allocation2], %s2552_s20 }
 0x136   : > { %s809_s10 = scalar_lea.sflag (!%p1981_p3), [#allocation3], %s2546_s8 }
 0x13c   : > { %s804_s19 = scalar_select %p803_p4, %s798_s12, 0 }
 0x13e   : > { %s2756_s19 = smov (!%p1982_p5, %s804_s19), 63 }
 0x13f   : > { %s807_s15 = scalar_lea.vmem %s2714_s1, %s2756_s19 }
 0x140   : > { %v827_v16 = vld [vmem:[%s807_s15] sm:$0x1] }
 0x141   : > { %828 = vst [vmem:[%s808_s23] sm:$0x1] %v827_v16 }
 0x142   : > { %853 = vsyncadd %s809_s10, 16 }
 0x143 PF: > { %p1987_p6 = scmp.ne.s32.totalorder %s798_s12, 0 }
 0x144   : > { %vm859_vm8 = vcmask (!%p1987_p6), 253952   ;;  %s858_s25 = scalar_lea.vmem (!%p1987_p6), [#allocation2], %s2552_s20  ;;  %v2360_v17 = vmov (!%p1987_p6), 0.0  }
 0x145   : > { %857 = sbr.rel (%p1987_p6) target bundleno = 332 (0x14c), region = 386  ;;  %860 = vst.msk [vmem:[%s858_s25] sm:$0x1] (!%p1987_p6), %vm859_vm8, %v2360_v17 }
 0x14c PF: > { %s861_s17 = sadd.s32 1, %s2549_s18 }
 0x14d   : > { %s862_s5 = sld [smem:[#allocation5 + %s861_s17]] }
 0x153   : > { %p1988_p7 = scmp.eq.s32.totalorder %s862_s5, 0 }
 0x154   : > { %p867_p8 = scmp.gt.s32.totalorder (!%p1988_p7), %s862_s5, 0  ;;  %p1989_p10 = scmp.lt.s32.totalorder (!%p1988_p7), %s862_s5, 63 }
 0x155   : > { %866 = sbr.rel (%p1988_p7) target bundleno = 355 (0x163), region = 390  ;;  %s1613_s15 = scalar_lea.vmem (!%p1988_p7), [#allocation2], %s2552_s20 }
 0x156   : > { %s874_s23 = scalar_lea.sflag (!%p1988_p7), [#allocation3], %s2546_s8 }
 0x15c   : > { %s868_s19 = scalar_select %p867_p8, %s862_s5, 0 }
 0x15e   : > { %s2758_s19 = smov (!%p1989_p10, %s868_s19), 63 }
 0x15f   : > { %s872_s22 = scalar_lea.vmem %s2714_s1, %s2758_s19 }
 0x160   : > { %v892_v18 = vld [vmem:[%s872_s22] sm:$0x1] }
 0x161   : > { %1996 = vst [vmem:[%s1613_s15 + $0x1] sm:$0x1] %v892_v18 }
 0x162   : > { %918 = vsyncadd %s874_s23, 16 }
 0x163 PF: > { %p1997_p11 = scmp.ne.s32.totalorder %s862_s5, 0 }
 0x164   : > { %vm925_vm9 = vcmask (!%p1997_p11), 253952   ;;  %s1620_s10 = scalar_lea.vmem (!%p1997_p11), [#allocation2], %s2552_s20  ;;  %v2361_v19 = vmov (!%p1997_p11), 0.0  }
 0x165   : > { %922 = sbr.rel (%p1997_p11) target bundleno = 364 (0x16c), region = 424  ;;  %1999 = vst.msk [vmem:[%s1620_s10 + $0x1] sm:$0x1] (!%p1997_p11), %vm925_vm9, %v2361_v19 }
 0x16c PF: > { %s927_s25 = sadd.s32 2, %s2549_s18 }
 0x16d   : > { %s928_s17 = sld [smem:[#allocation5 + %s927_s25]] }
 0x173   : > { %p2000_p12 = scmp.eq.s32.totalorder %s928_s17, 0 }
 0x174   : > { %p933_p0 = scmp.gt.s32.totalorder (!%p2000_p12), %s928_s17, 0  ;;  %p2001_p1 = scmp.lt.s32.totalorder (!%p2000_p12), %s928_s17, 63 }
 0x175   : > { %932 = sbr.rel (%p2000_p12) target bundleno = 387 (0x183), region = 428  ;;  %s1624_s22 = scalar_lea.vmem (!%p2000_p12), [#allocation2], %s2552_s20 }
 0x176   : > { %s940_s15 = scalar_lea.sflag (!%p2000_p12), [#allocation3], %s2546_s8 }
 0x17c   : > { %s934_s19 = scalar_select %p933_p0, %s928_s17, 0 }
 0x17e   : > { %s2760_s19 = smov (!%p2001_p1, %s934_s19), 63 }
 0x17f   : > { %s938_s12 = scalar_lea.vmem %s2714_s1, %s2760_s19 }
 0x180   : > { %v958_v20 = vld [vmem:[%s938_s12] sm:$0x1] }
 0x181   : > { %2008 = vst [vmem:[%s1624_s22 + $0x2] sm:$0x1] %v958_v20 }
 0x182   : > { %984 = vsyncadd %s940_s15, 16 }
 0x183 PF: > { %p2009_p2 = scmp.ne.s32.totalorder %s928_s17, 0 }
 0x184   : > { %vm991_vm10 = vcmask (!%p2009_p2), 253952   ;;  %s1631_s23 = scalar_lea.vmem (!%p2009_p2), [#allocation2], %s2552_s20  ;;  %v2362_v21 = vmov (!%p2009_p2), 0.0  }
 0x185   : > { %988 = sbr.rel (%p2009_p2) target bundleno = 396 (0x18c), region = 462  ;;  %2011 = vst.msk [vmem:[%s1631_s23 + $0x2] sm:$0x1] (!%p2009_p2), %vm991_vm10, %v2362_v21 }
 0x18c PF: > { %s993_s10 = sadd.s32 3, %s2549_s18 }
 0x18d   : > { %s994_s25 = sld [smem:[#allocation5 + %s993_s10]] }
 0x193   : > { %p2012_p3 = scmp.eq.s32.totalorder %s994_s25, 0 }
 0x194   : > { %p999_p4 = scmp.gt.s32.totalorder (!%p2012_p3), %s994_s25, 0  ;;  %p2013_p5 = scmp.lt.s32.totalorder (!%p2012_p3), %s994_s25, 63 }
 0x195   : > { %998 = sbr.rel (%p2012_p3) target bundleno = 419 (0x1a3), region = 466  ;;  %s1635_s12 = scalar_lea.vmem (!%p2012_p3), [#allocation2], %s2552_s20 }
 0x196   : > { %s1006_s22 = scalar_lea.sflag (!%p2012_p3), [#allocation3], %s2546_s8 }
 0x19c   : > { %s1000_s19 = scalar_select %p999_p4, %s994_s25, 0 }
 0x19e   : > { %s2762_s19 = smov (!%p2013_p5, %s1000_s19), 63 }
 0x19f   : > { %s1004_s5 = scalar_lea.vmem %s2714_s1, %s2762_s19 }
 0x1a0   : > { %v1024_v22 = vld [vmem:[%s1004_s5] sm:$0x1] }
 0x1a1   : > { %2020 = vst [vmem:[%s1635_s12 + $0x3] sm:$0x1] %v1024_v22 }
 0x1a2   : > { %1050 = vsyncadd %s1006_s22, 16 }
 0x1a3 PF: > { %p2021_p6 = scmp.ne.s32.totalorder %s994_s25, 0 }
 0x1a4   : > { %vm1057_vm11 = vcmask (!%p2021_p6), 253952   ;;  %s1642_s15 = scalar_lea.vmem (!%p2021_p6), [#allocation2], %s2552_s20  ;;  %v2363_v23 = vmov (!%p2021_p6), 0.0  }
 0x1a5   : > { %1054 = sbr.rel (%p2021_p6) target bundleno = 428 (0x1ac), region = 500  ;;  %2023 = vst.msk [vmem:[%s1642_s15 + $0x3] sm:$0x1] (!%p2021_p6), %vm1057_vm11, %v2363_v23 }
 0x1ac PF: > { %s1059_s23 = sadd.s32 4, %s2549_s18 }
 0x1ad   : > { %s1060_s10 = sld [smem:[#allocation5 + %s1059_s23]] }
 0x1b3   : > { %p2024_p7 = scmp.eq.s32.totalorder %s1060_s10, 0 }
 0x1b4   : > { %p1065_p8 = scmp.gt.s32.totalorder (!%p2024_p7), %s1060_s10, 0  ;;  %p2025_p10 = scmp.lt.s32.totalorder (!%p2024_p7), %s1060_s10, 63 }
 0x1b5   : > { %1064 = sbr.rel (%p2024_p7) target bundleno = 451 (0x1c3), region = 504  ;;  %s1646_s5 = scalar_lea.vmem (!%p2024_p7), [#allocation2], %s2552_s20 }
 0x1b6   : > { %s1072_s12 = scalar_lea.sflag (!%p2024_p7), [#allocation3], %s2546_s8 }
 0x1bc   : > { %s1066_s19 = scalar_select %p1065_p8, %s1060_s10, 0 }
 0x1be   : > { %s2764_s19 = smov (!%p2025_p10, %s1066_s19), 63 }
 0x1bf   : > { %s1070_s17 = scalar_lea.vmem %s2714_s1, %s2764_s19 }
 0x1c0   : > { %v1090_v24 = vld [vmem:[%s1070_s17] sm:$0x1] }
 0x1c1   : > { %2032 = vst [vmem:[%s1646_s5 + $0x4] sm:$0x1] %v1090_v24 }
 0x1c2   : > { %1116 = vsyncadd %s1072_s12, 16 }
 0x1c3 PF: > { %p2033_p11 = scmp.ne.s32.totalorder %s1060_s10, 0 }
 0x1c4   : > { %vm1123_vm12 = vcmask (!%p2033_p11), 253952   ;;  %s1653_s22 = scalar_lea.vmem (!%p2033_p11), [#allocation2], %s2552_s20  ;;  %v2364_v25 = vmov (!%p2033_p11), 0.0  }
 0x1c5   : > { %1120 = sbr.rel (%p2033_p11) target bundleno = 460 (0x1cc), region = 538  ;;  %2035 = vst.msk [vmem:[%s1653_s22 + $0x4] sm:$0x1] (!%p2033_p11), %vm1123_vm12, %v2364_v25 }
 0x1cc PF: > { %s1125_s15 = sadd.s32 5, %s2549_s18 }
 0x1cd   : > { %s1126_s23 = sld [smem:[#allocation5 + %s1125_s15]] }
 0x1d3   : > { %p2036_p12 = scmp.eq.s32.totalorder %s1126_s23, 0 }
 0x1d4   : > { %p1131_p0 = scmp.gt.s32.totalorder (!%p2036_p12), %s1126_s23, 0  ;;  %p2037_p1 = scmp.lt.s32.totalorder (!%p2036_p12), %s1126_s23, 63 }
 0x1d5   : > { %1130 = sbr.rel (%p2036_p12) target bundleno = 483 (0x1e3), region = 542  ;;  %s1657_s17 = scalar_lea.vmem (!%p2036_p12), [#allocation2], %s2552_s20 }
 0x1d6   : > { %s1138_s5 = scalar_lea.sflag (!%p2036_p12), [#allocation3], %s2546_s8 }
 0x1dc   : > { %s1132_s19 = scalar_select %p1131_p0, %s1126_s23, 0 }
 0x1de   : > { %s2766_s19 = smov (!%p2037_p1, %s1132_s19), 63 }
 0x1df   : > { %s1136_s25 = scalar_lea.vmem %s2714_s1, %s2766_s19 }
 0x1e0   : > { %v1156_v26 = vld [vmem:[%s1136_s25] sm:$0x1] }
 0x1e1   : > { %2044 = vst [vmem:[%s1657_s17 + $0x5] sm:$0x1] %v1156_v26 }
 0x1e2   : > { %1182 = vsyncadd %s1138_s5, 16 }
 0x1e3 PF: > { %p2045_p2 = scmp.ne.s32.totalorder %s1126_s23, 0 }
 0x1e4   : > { %vm1189_vm13 = vcmask (!%p2045_p2), 253952   ;;  %s1664_s12 = scalar_lea.vmem (!%p2045_p2), [#allocation2], %s2552_s20  ;;  %v2365_v27 = vmov (!%p2045_p2), 0.0  }
 0x1e5   : > { %1186 = sbr.rel (%p2045_p2) target bundleno = 492 (0x1ec), region = 576  ;;  %2047 = vst.msk [vmem:[%s1664_s12 + $0x5] sm:$0x1] (!%p2045_p2), %vm1189_vm13, %v2365_v27 }
 0x1ec PF: > { %s1191_s22 = sadd.s32 6, %s2549_s18 }
 0x1ed   : > { %s1192_s15 = sld [smem:[#allocation5 + %s1191_s22]] }
 0x1f3   : > { %p2048_p3 = scmp.eq.s32.totalorder %s1192_s15, 0 }
 0x1f4   : > { %p1197_p4 = scmp.gt.s32.totalorder (!%p2048_p3), %s1192_s15, 0  ;;  %p2049_p5 = scmp.lt.s32.totalorder (!%p2048_p3), %s1192_s15, 63 }
 0x1f5   : > { %1196 = sbr.rel (%p2048_p3) target bundleno = 515 (0x203), region = 580  ;;  %s1668_s25 = scalar_lea.vmem (!%p2048_p3), [#allocation2], %s2552_s20 }
 0x1f6   : > { %s1204_s17 = scalar_lea.sflag (!%p2048_p3), [#allocation3], %s2546_s8 }
 0x1fc   : > { %s1198_s19 = scalar_select %p1197_p4, %s1192_s15, 0 }
 0x1fe   : > { %s2768_s19 = smov (!%p2049_p5, %s1198_s19), 63 }
 0x1ff   : > { %s1202_s10 = scalar_lea.vmem %s2714_s1, %s2768_s19 }
 0x200   : > { %v1222_v28 = vld [vmem:[%s1202_s10] sm:$0x1] }
 0x201   : > { %2056 = vst [vmem:[%s1668_s25 + $0x6] sm:$0x1] %v1222_v28 }
 0x202   : > { %1248 = vsyncadd %s1204_s17, 16 }
 0x203 PF: > { %p2057_p6 = scmp.ne.s32.totalorder %s1192_s15, 0 }
 0x204   : > { %vm1255_vm14 = vcmask (!%p2057_p6), 253952   ;;  %s1675_s5 = scalar_lea.vmem (!%p2057_p6), [#allocation2], %s2552_s20  ;;  %v2366_v29 = vmov (!%p2057_p6), 0.0  }
 0x205   : > { %1252 = sbr.rel (%p2057_p6) target bundleno = 524 (0x20c), region = 614  ;;  %2059 = vst.msk [vmem:[%s1675_s5 + $0x6] sm:$0x1] (!%p2057_p6), %vm1255_vm14, %v2366_v29 }
 0x20c PF: > { %s1257_s12 = sadd.s32 7, %s2549_s18 }
 0x20d   : > { %s1258_s22 = sld [smem:[#allocation5 + %s1257_s12]] }
 0x213   : > { %p2060_p7 = scmp.eq.s32.totalorder %s1258_s22, 0 }
 0x214   : > { %p1263_p8 = scmp.gt.s32.totalorder (!%p2060_p7), %s1258_s22, 0  ;;  %p2061_p10 = scmp.lt.s32.totalorder (!%p2060_p7), %s1258_s22, 63 }
 0x215   : > { %1262 = sbr.rel (%p2060_p7) target bundleno = 547 (0x223), region = 618  ;;  %s1679_s10 = scalar_lea.vmem (!%p2060_p7), [#allocation2], %s2552_s20 }
 0x216   : > { %s1270_s25 = scalar_lea.sflag (!%p2060_p7), [#allocation3], %s2546_s8 }
 0x21c   : > { %s1264_s19 = scalar_select %p1263_p8, %s1258_s22, 0 }
 0x21e   : > { %s2770_s19 = smov (!%p2061_p10, %s1264_s19), 63 }
 0x21f   : > { %s1268_s23 = scalar_lea.vmem %s2714_s1, %s2770_s19 }
 0x220   : > { %v1288_v30 = vld [vmem:[%s1268_s23] sm:$0x1] }
 0x221   : > { %2068 = vst [vmem:[%s1679_s10 + $0x7] sm:$0x1] %v1288_v30 }
 0x222   : > { %1314 = vsyncadd %s1270_s25, 16 }
 0x223 PF: > { %p2069_p11 = scmp.ne.s32.totalorder %s1258_s22, 0 }
 0x224   : > { %vm1321_vm15 = vcmask (!%p2069_p11), 253952   ;;  %s1686_s18 = scalar_lea.vmem (!%p2069_p11), [#allocation2], %s2552_s20  ;;  %v2367_v31 = vmov (!%p2069_p11), 0.0  }
 0x225   : > { %1318 = sbr.rel (%p2069_p11) target bundleno = 556 (0x22c), region = 652  ;;  %2071 = vst.msk [vmem:[%s1686_s18 + $0x7] sm:$0x1] (!%p2069_p11), %vm1321_vm15, %v2367_v31 }
 0x22c PF: > { %s2611_s17 = sshll.u32 %s2341_s28, 3  ;;  %s2073_s5 = sshll.u32 %s2738_s7, 3 }
 0x22d   : > { %s1327_s12 = sld [smem:[#allocation5 + %s2611_s17]]  ;;  %s2616_s8 = scalar_lea.sflag [#allocation3], %s2738_s7 }
 0x233   : > { %p2146_p12 = scmp.ne.s32.totalorder %s1327_s12, 0 }
 0x235   : > { %2292 = dma.done.wait (%p2146_p12), %s2616_s8, 16 }
 0x236   : > { %2294 = vsyncadd (%p2146_p12), %s2616_s8, 4294967280  ;;  %s1336_s20 = sadd.s32 1, %s2611_s17 }
 0x237   : > { %s1337_s22 = sld [smem:[#allocation5 + %s1336_s20]] }
 0x23d   : > { %p2147_p0 = scmp.ne.s32.totalorder %s1337_s22, 0 }
 0x23f   : > { %2296 = dma.done.wait (%p2147_p0), %s2616_s8, 16 }
 0x240   : > { %2298 = vsyncadd (%p2147_p0), %s2616_s8, 4294967280  ;;  %s1346_s19 = sadd.s32 2, %s2611_s17 }
 0x241   : > { %s1347_s21 = sld [smem:[#allocation5 + %s1346_s19]] }
 0x247   : > { %p2148_p1 = scmp.ne.s32.totalorder %s1347_s21, 0 }
 0x249   : > { %2300 = dma.done.wait (%p2148_p1), %s2616_s8, 16 }
 0x24a   : > { %2302 = vsyncadd (%p2148_p1), %s2616_s8, 4294967280  ;;  %s1356_s15 = sadd.s32 3, %s2611_s17 }
 0x24b   : > { %s1357_s23 = sld [smem:[#allocation5 + %s1356_s15]] }
 0x251   : > { %p2149_p2 = scmp.ne.s32.totalorder %s1357_s23, 0 }
 0x253   : > { %2304 = dma.done.wait (%p2149_p2), %s2616_s8, 16 }
 0x254   : > { %2306 = vsyncadd (%p2149_p2), %s2616_s8, 4294967280  ;;  %s1366_s10 = sadd.s32 4, %s2611_s17 }
 0x255   : > { %s1367_s25 = sld [smem:[#allocation5 + %s1366_s10]] }
 0x25b   : > { %p2150_p3 = scmp.ne.s32.totalorder %s1367_s25, 0 }
 0x25d   : > { %2308 = dma.done.wait (%p2150_p3), %s2616_s8, 16 }
 0x25e   : > { %2310 = vsyncadd (%p2150_p3), %s2616_s8, 4294967280  ;;  %s1376_s18 = sadd.s32 5, %s2611_s17 }
 0x25f   : > { %s1377_s12 = sld [smem:[#allocation5 + %s1376_s18]] }
 0x265   : > { %p2151_p4 = scmp.ne.s32.totalorder %s1377_s12, 0 }
 0x267   : > { %2312 = dma.done.wait (%p2151_p4), %s2616_s8, 16 }
 0x268   : > { %2314 = vsyncadd (%p2151_p4), %s2616_s8, 4294967280  ;;  %s1386_s20 = sadd.s32 6, %s2611_s17 }
 0x269   : > { %s1387_s22 = sld [smem:[#allocation5 + %s1386_s20]] }
 0x26f   : > { %p2152_p5 = scmp.ne.s32.totalorder %s1387_s22, 0 }
 0x271   : > { %2316 = dma.done.wait (%p2152_p5), %s2616_s8, 16 }
 0x272   : > { %2318 = vsyncadd (%p2152_p5), %s2616_s8, 4294967280  ;;  %s1396_s19 = sadd.s32 7, %s2611_s17 }
 0x273   : > { %s1397_s21 = sld [smem:[#allocation5 + %s1396_s19]] }
 0x279   : > { %p2153_p6 = scmp.ne.s32.totalorder %s1397_s21, 0 }
 0x27b   : > { %2320 = dma.done.wait (%p2153_p6), %s2616_s8, 16 }
 0x27c   : > { %2322 = vsyncadd (%p2153_p6), %s2616_s8, 4294967280  ;;  %v2368_v32 = vmov 0   ;;  %s1406_s15 = scalar_lea.vmem [#allocation2], %s2073_s5  ;;  %v1408_v34 = vld [vmem:[%s2715_s2] sm:$0xff]  ;;  %vm1410_vm0 = vcmask 261120   ;;  %s2085_s8 = sshll.u32 %s2341_s28, 7 }
 0x27d   : > { %2221 = vset.pattern.permute.xlu1 %v2368_v32  ;;  %2222 = vset.pattern.permute.xlu0 %v2368_v32  ;;  %v1407_v33 = vld [vmem:[%s1406_s15] sm:$0xff]  ;;  %s2725_s25 = scalar_lea.vmem [#allocation6], %s2467_s16  ;;  %s2661_s22 = scalar_lea.hbm %s2719_s6, %s2085_s8 }
 0x27e   : > { %v1443_v35 = vld [vmem:[%s2476_s24] sm:$0xff]  ;;  %v1409_v36 = vadd.f32 %v1408_v34, %v1407_v33  ;;  %s1466_s18 = sshll.u32 %s2725_s25, 4  ;;  %s2726_s19 = smov %s2725_s25  ;;  %s2663_s18 = int_to_ptr.vmem [resolvable:$true] %s1466_s18 }
 0x27f   : > { %1446 = vperm.xlu1 %2221, %v1443_v35   ;;  %v2082_v50 = vld [vmem:[%s2716_s3] ss:$0 sm:$0xff]  ;;  %s2727_s21 = sand.u32 1, %s2333_s27   ;;  %s2237_s28 = scalar_lea.vmem %s2663_s18, 128 }
 0x280   : > { %v1411_v37 = vsel %vm1410_vm0, %v1409_v36, 0.0  ;;  %v1414_v38 = vmul.f32 %v1409_v36, %v1409_v36  ;;  %v2083_v52 = vld [vmem:[%s2717_s4] ss:$0 sm:$0xff]  ;;  %s1452_s15 = scalar_lea.sflag [#allocation7], %s2727_s21  ;;  %p2238_p7 = scmp.ne.s32.totalorder %s2663_s18, %s2237_s28 }
 0x281   : > { %1412 = vadd.xlane.f32.xlu0 %v1411_v37  ;;  %s2369_s23 = smov [#allocation6]  }
 0x282   : > { %v1415_v39 = vsel %vm1410_vm0, %v1414_v38, 0.0  ;;  %p2239_p8 = pnand %p2238_p7, %p2448_p9  ;;  %s2241_s10 = sshll.u32 %s2369_s23, 4  ;;  %s2242_s10 = int_to_ptr.vmem [resolvable:$false] %s2241_s10 }
 0x283   : > { %s2243_s24 = scalar_lea.vmem %s2242_s10, 256  ;;  %p2244_p11 = scmp.lt.s32.totalorder %s2663_s18, %s2242_s10 }
 0x284   : > { %p2240_p10 = pneg %p2239_p8  ;;  %p2245_p12 = scmp.lt.s32.totalorder %s2243_s24, %s2237_s28 }
 0x285   : > { %1416 = vadd.xlane.f32.xlu0 %v1415_v39 }
 0x286   : > { %p2246_p0 = por %p2245_p12, %p2244_p11 }
 0x288   : > { %p2247_p1 = pnand %p2246_p0, %p2240_p10 }
 0x2fe   : > { %v1447_v54 = vpop.permute.xlu1 %1446 }
 0x30e   : > { %v1413_v40 = vpop.xlane.xlu0 %1412 }
 0x30f   : > { %v1418_v41 = vmul.f32 0.03125, %v1413_v40 }
 0x311   : > { %v1420_v43 = vmul.f32 %v1418_v41, %v1418_v41  ;;  %v1423_v48 = vsub.f32 %v1409_v36, %v1418_v41 }
 0x312   : > { %v1417_v42 = vpop.xlane.xlu0 %1416 }
 0x313   : > { %v1419_v44 = vmul.f32 0.03125, %v1417_v42 }
 0x315   : > { %v1421_v45 = vsub.f32 %v1419_v44, %v1420_v43 }
 0x317   : > { %v1422_v46 = vmax.f32 %v1421_v45, 0.0 }
 0x319   : > { %v1424_v47 = vadd.f32 1e-08, %v1422_v46 }
 0x31b   : > { %2223 = vrsqrt.f32 %v1424_v47 }
 0x325   : > { %v2224_v49 = vpop.eup %2223 }
 0x326   : > { %v1426_v51 = vmul.f32 %v2224_v49, %v1423_v48 }
 0x328   : > { %v1434_v53 = vmul.f32 %v2082_v50, %v1426_v51 }
 0x32a   : > { %v1442_v55 = vadd.f32 %v2083_v52, %v1434_v53 }
 0x32c   : > { %v1449_v56 = vmul.f32 %v1447_v54, %v1442_v55 }
 0x32e   : > { %1450 = vst.msk [vmem:[%s2726_s19] sm:$0xff] %vm1410_vm0, %v1449_v56 }
 0x32f   : > { %2250 = shalt.err (!%p2247_p1)
}
 0x330   : > { %s2251_s16 = scalar_lea.hbm %s2661_s22, 128  ;;  %s2255_s5 = scalar_lea.hbm %s2719_s6, 256 }
 0x331   : > { %p2252_p2 = scmp.ne.s32.totalorder %s2661_s22, %s2251_s16  ;;  %p2256_p5 = scmp.lt.u32.totalorder %s2661_s22, %s2719_s6 }
 0x332   : > { %p2257_p6 = scmp.lt.u32.totalorder %s2255_s5, %s2251_s16  ;;  %p2259_p8 = scmp.lt.u32.totalorder %s2251_s16, %s2661_s22 }
 0x333   : > { %p2253_p3 = pnand %p2252_p2, %p2448_p9 }
 0x334   : > { %p2258_p7 = por %p2257_p6, %p2256_p5 }
 0x335   : > { %p2254_p4 = pneg %p2253_p3 }
 0x336   : > { %p2260_p10 = por %p2259_p8, %p2258_p7 }
 0x338   : > { %p2261_p11 = pnand %p2260_p10, %p2254_p4 }
 0x33a   : > { %2264 = shalt.err (!%p2261_p11)
}
 0x33b   : > { %2140 = dma.vmem_to_hbm [thread:$0]  (%p2448_p9), %s2663_s18, 128, %s2661_s22, %s1452_s15  }
 0x33c PF: > { %p2154_p12 = scmp.ge.s32.totalorder %s2349_s30, 2  ;;  %s1478_s12 = sand.u32 1, %s2329_s26  }
 0x33d   : > { %s1479_s20 = scalar_lea.sflag [#allocation7], %s1478_s12 }
 0x33e   : > { %p2143_p0 = pnand %p2154_p12, %p2455_p13 }
 0x340   : > { %2324 = dma.done.wait (!%p2143_p0), %s1479_s20, 128  }
 0x341   : > { %2326 = vsyncadd (!%p2143_p0), %s1479_s20, 4294967168  ;;  %s25_s30 = sadd.s32 1, %s2349_s30   ;;  %s2728_s26 = smov %s2333_s27 }
 0x342   : > { %p22_p1 = scmp.ge.s32.totalorder %s25_s30, 4   ;;  %s2729_s27 = smov %s2337_s0 }
 0x343   : > { %s2730_s0 = smov %s2461_s14  ;;  %s2731_s28 = smov %s2345_s29 }
 0x344   : > { %s2732_s29 = smov %s2734_s9  ;;  %24 = sbr.rel (!%p22_p1) target bundleno = 19 (0x13), region = 956 }
 0x34b   :  { %1484 = vsyncpa [#allocation7], 1 }
 0x34c   :  { %1486 = vsyncpa [#allocation7 + $0x1], 1 }
 0x34d   :  { %1487 = vsyncmov [#allocation3] }
 0x350   :  { %s1488_s11 = vpop.sfrf %1487 }
 0x351   :  { %p2088_p9 = scmp.ne.s32.totalorder %s1488_s11, 0 }
 0x353   :  { %1492 = shalt.err (%p2088_p9)  }
 0x354   :  { %1494 = vsyncmov [#allocation3 + $0x1] }
 0x357   :  { %s1495_s13 = vpop.sfrf %1494 }
 0x358   :  { %p2089_p13 = scmp.ne.s32.totalorder %s1495_s13, 0 }
 0x35a   :  { %1499 = shalt.err (%p2089_p13)  }

</bundles_post_ra>
